<compile_context>
chip_gen: v6e
topology: v6e:2x2x1
jax: 0.10.0
libtpu: 0.0.40
codegen_flags: <defaults>
</compile_context>

<pallas_src>
import functools

import jax
import jax.numpy as jnp
from jax.experimental import pallas as pl
from jax.experimental.pallas import tpu as pltpu


# ------------------------------ fused kernel --------------------------------

def _channel_embed_kernel(x_ref, w1_ref, b1_ref, wdw_ref, b2_ref,
                          w3_ref, wres_ref, bfin_ref,
                          ml_ref, mr_ref, mt_ref, mb_ref, o_ref, *, W):
    """One block of Bblk images (flattened to M = Bblk*H*W tokens) per step."""
    M = x_ref.shape[0]

    x = x_ref[...]                                    # (M, Cin) f32
    xb = x.astype(jnp.bfloat16)                       # MXU operand

    # --- 1x1 conv (channel_embed[0]): t = x @ W1 + b1 (bf16 MXU, f32 acc) ----
    t = (jnp.dot(xb, w1_ref[...], preferred_element_type=jnp.float32)
         + b1_ref[...])                               # (M, Cmid) f32

    # --- depthwise 3x3 conv, padding=1, + bias + ReLU -------------------------
    # Token n = row*W + col; tap (dy, dx) is t[n + dy*W + dx]. Shifts are
    # circular XLU rolls; every wrapped / out-of-image / cross-image element
    # is killed by the precomputed 0/1 border masks (periodic in the block).
    wdw = wdw_ref[...]                                # (9, Cmid) f32
    tl = pltpu.roll(t, 1, axis=0) * ml_ref[...]       # t[n-1], zero at col==0
    tr = pltpu.roll(t, M - 1, axis=0) * mr_ref[...]   # t[n+1], zero at col==W-1

    g_up = wdw[0] * tl + wdw[1] * t + wdw[2] * tr     # taps of the row above
    g_mid = wdw[3] * tl + wdw[4] * t + wdw[5] * tr    # same-row taps
    g_dn = wdw[6] * tl + wdw[7] * t + wdw[8] * tr     # taps of the row below

    acc = (pltpu.roll(g_up, W, axis=0) * mt_ref[...]      # zero at row==0
           + g_mid
           + pltpu.roll(g_dn, M - W, axis=0) * mb_ref[...])  # zero at row==H-1
    y = jnp.maximum(acc + b2_ref[...], 0.0)           # (M, Cmid) f32

    # --- final 1x1 conv (+BN1) and residual 1x1 conv (+BN2), bias folded -----
    # Kept as two dots (tiny K; avoids a lane-offset concat relayout) — the
    # compiler accumulates both into the same f32 result.
    o_ref[...] = (jnp.dot(y.astype(jnp.bfloat16), w3_ref[...],
                          preferred_element_type=jnp.float32)
                  + jnp.dot(xb, wres_ref[...],
                            preferred_element_type=jnp.float32)
                  + bfin_ref[...])


# -------------------------------- wrapper ------------------------------------

def _pick_block_batch(B, N, target_m=256):
    """Images per grid step: aim for M ~ 256 rows (v6e/v7x MXU) but keep the
    parallel grid axis length >= 2 (v7x megacore) and divisible into B."""
    bblk = max(1, min(B, target_m // max(N, 1)))
    while bblk > 1 and (B % bblk != 0 or B // bblk < 2):
        bblk -= 1
    return bblk


def channel_embed_forward(x, H, W, params, *, block_batch=None,
                          out_layout="NCHW"):
    """x: (B, N, Cin) float32, N = H*W.

    out_layout="NCHW" matches PyTorch (B, Cout, H, W); pass "BNC" to skip the
    wrapper-side transpose when the consumer can take token-major output.
    """
    B, N, Cin = x.shape
    assert N == H * W
    assert N % 8 == 0, "H*W should be a multiple of 8 for clean sublane tiling"
    Cmid = params["w1"].shape[1]
    Cout = params["w3f"].shape[1]

    Bblk = block_batch if block_batch is not None else _pick_block_batch(B, N)
    assert B % Bblk == 0, "pad the batch or pick a divisor block_batch"
    M = Bblk * N

    # Per-token 0/1 border masks (periodic over the Bblk images in a block);
    # fetched once (constant index_map) and reused across all grid steps.
    col = jnp.tile(jnp.arange(N, dtype=jnp.int32) % W, Bblk)
    row = jnp.tile(jnp.arange(N, dtype=jnp.int32) // W, Bblk)
    m_l = (col > 0).astype(jnp.float32)[:, None]       # (M, 1)
    m_r = (col < W - 1).astype(jnp.float32)[:, None]
    m_t = (row > 0).astype(jnp.float32)[:, None]
    m_b = (row < H - 1).astype(jnp.float32)[:, None]

    x_tok = x.reshape(B * N, Cin)                      # layout-preserving

    const = lambda i: (0, 0)
    out_tok = pl.pallas_call(
        functools.partial(_channel_embed_kernel, W=W),
        out_shape=jax.ShapeDtypeStruct((B * N, Cout), jnp.float32),
        grid=(B // Bblk,),
        in_specs=[
            pl.BlockSpec((M, Cin), lambda i: (i, 0)),   # x tokens
            pl.BlockSpec((Cin, Cmid), const),           # w1 (bf16)
            pl.BlockSpec((1, Cmid), const),             # b1
            pl.BlockSpec((9, Cmid), const),             # depthwise taps (f32)
            pl.BlockSpec((1, Cmid), const),             # b2
            pl.BlockSpec((Cmid, Cout), const),          # w3 * bn1_s * bn2_s (bf16)
            pl.BlockSpec((Cin, Cout), const),           # w_res * bn2_s (bf16)
            pl.BlockSpec((1, Cout), const),             # folded bias
            pl.BlockSpec((M, 1), const),                # mask: col > 0
            pl.BlockSpec((M, 1), const),                # mask: col < W-1
            pl.BlockSpec((M, 1), const),                # mask: row > 0
            pl.BlockSpec((M, 1), const),                # mask: row < H-1
        ],
        out_specs=pl.BlockSpec((M, Cout), lambda i: (i, 0)),
        compiler_params=pltpu.CompilerParams(
            dimension_semantics=("parallel",)),
    )(x_tok, params["w1"], params["b1"], params["w_dw"], params["b2"],
      params["w3f"], params["w_resf"], params["b_fin"], m_l, m_r, m_t, m_b)

    out = out_tok.reshape(B, N, Cout)
    if out_layout == "NCHW":   # PyTorch parity; skip if consumer takes NHWC/BNC
        out = out.reshape(B, H, W, Cout).transpose(0, 3, 1, 2)
    return out


def prepare_params(torch_p, eps=1e-5):
    """Fold inference BN into the final/residual 1x1 weights and a single bias;
    cast MXU weights to bf16 once. torch_p holds PyTorch-layout tensors."""
    Cmid = torch_p["w1_t"].shape[0]
    Cin = torch_p["w1_t"].shape[1]
    Cout = torch_p["w3_t"].shape[0]

    bn1_s = torch_p["g1"] / jnp.sqrt(torch_p["v1"] + eps)
    bn1_b = torch_p["be1"] - torch_p["m1"] * bn1_s
    bn2_s = torch_p["g2"] / jnp.sqrt(torch_p["v2"] + eps)
    bn2_b = torch_p["be2"] - torch_p["m2"] * bn2_s

    w1 = torch_p["w1_t"].reshape(Cmid, Cin).T          # (Cin, Cmid)
    w_dw = torch_p["w_dw_t"].reshape(Cmid, 9).T        # (9, Cmid)
    w3 = torch_p["w3_t"].reshape(Cout, Cmid).T         # (Cmid, Cout)
    w_res = torch_p["w_res_t"].reshape(Cout, Cin).T    # (Cin, Cout)

    return dict(
        w1=w1.astype(jnp.bfloat16),
        b1=torch_p["b1"][None, :],
        w_dw=w_dw,                                     # depthwise stays f32
        b2=torch_p["b2"][None, :],
        w3f=(w3 * (bn1_s * bn2_s)[None, :]).astype(jnp.bfloat16),
        w_resf=(w_res * bn2_s[None, :]).astype(jnp.bfloat16),
        b_fin=((torch_p["b3"] * bn1_s + bn1_b) * bn2_s + bn2_b)[None, :],
    )


# --------------------------- pure-JAX reference ------------------------------

def _reference(x, H, W, t):
    B, N, Cin = x.shape
    xi = jnp.transpose(x, (0, 2, 1)).reshape(B, Cin, H, W)

    def conv1x1(v, w, b=None):
        y = jax.lax.conv_general_dilated(v, w, (1, 1), "VALID")
        return y if b is None else y + b[None, :, None, None]

    def bn(v, g, bt, m, var, eps=1e-5):
        s = g / jnp.sqrt(var + eps)
        return (v - m[None, :, None, None]) * s[None, :, None, None] \
            + bt[None, :, None, None]

    res = conv1x1(xi, t["w_res_t"])
    z = conv1x1(xi, t["w1_t"], t["b1"])
    z = jax.lax.conv_general_dilated(
        z, t["w_dw_t"], (1, 1), ((1, 1), (1, 1)),
        feature_group_count=t["w_dw_t"].shape[0]) + t["b2"][None, :, None, None]
    z = jnp.maximum(z, 0.0)
    z = conv1x1(z, t["w3_t"], t["b3"])
    z = bn(z, t["g1"], t["be1"], t["m1"], t["v1"])
    return bn(res + z, t["g2"], t["be2"], t["m2"], t["v2"])


# --------------------------------- main --------------------------------------

if __name__ == "__main__":
    B, Cin, Cout, H, W = 4, 16, 32, 8, 8
    reduction = 1
    Cmid = Cout // reduction
    N = H * W

    key = jax.random.PRNGKey(0)
    ks = jax.random.split(key, 16)

    # deterministic synthetic parameters (PyTorch-layout tensors)
    torch_p = dict(
        w_res_t=0.1 * jax.random.normal(ks[0], (Cout, Cin, 1, 1), jnp.float32),
        w1_t=0.1 * jax.random.normal(ks[1], (Cmid, Cin, 1, 1), jnp.float32),
        b1=0.05 * jax.random.normal(ks[2], (Cmid,), jnp.float32),
        w_dw_t=0.1 * jax.random.normal(ks[3], (Cmid, 1, 3, 3), jnp.float32),
        b2=0.05 * jax.random.normal(ks[4], (Cmid,), jnp.float32),
        w3_t=0.1 * jax.random.normal(ks[5], (Cout, Cmid, 1, 1), jnp.float32),
        b3=0.05 * jax.random.normal(ks[6], (Cout,), jnp.float32),
        g1=1.0 + 0.1 * jax.random.normal(ks[7], (Cout,), jnp.float32),
        be1=0.05 * jax.random.normal(ks[8], (Cout,), jnp.float32),
        m1=0.05 * jax.random.normal(ks[9], (Cout,), jnp.float32),
        v1=1.0 + 0.1 * jax.random.uniform(ks[10], (Cout,), jnp.float32),
        g2=1.0 + 0.1 * jax.random.normal(ks[11], (Cout,), jnp.float32),
        be2=0.05 * jax.random.normal(ks[12], (Cout,), jnp.float32),
        m2=0.05 * jax.random.normal(ks[13], (Cout,), jnp.float32),
        v2=1.0 + 0.1 * jax.random.uniform(ks[14], (Cout,), jnp.float32),
    )

    params = prepare_params(torch_p)
    x = jax.random.normal(ks[15], (B, N, Cin), jnp.float32)

    out = channel_embed_forward(x, H, W, params)       # (B, Cout, H, W)
    out = jax.block_until_ready(out)

    ref = _reference(x, H, W, torch_p)
    assert out.shape == (B, Cout, H, W)
    # bf16 MXU operands -> tolerance loosened vs the f32-only version.
    assert jnp.allclose(out, ref, rtol=5e-2, atol=5e-2), \
        float(jnp.max(jnp.abs(out - ref)))

    print("KERNEL_OK")
</pallas_src>

<mosaic_0001>
module attributes {stable_mosaic.version = 11 : i64} {
  func.func @_channel_embed_kernel(%arg0: i32, %arg1: memref<128x16xf32, #tpu.memory_space<vmem>>, %arg2: memref<16x32xbf16, #tpu.memory_space<vmem>>, %arg3: memref<1x32xf32, #tpu.memory_space<vmem>>, %arg4: memref<9x32xf32, #tpu.memory_space<vmem>>, %arg5: memref<1x32xf32, #tpu.memory_space<vmem>>, %arg6: memref<32x32xbf16, #tpu.memory_space<vmem>>, %arg7: memref<16x32xbf16, #tpu.memory_space<vmem>>, %arg8: memref<1x32xf32, #tpu.memory_space<vmem>>, %arg9: memref<128x1xf32, #tpu.memory_space<vmem>>, %arg10: memref<128x1xf32, #tpu.memory_space<vmem>>, %arg11: memref<128x1xf32, #tpu.memory_space<vmem>>, %arg12: memref<128x1xf32, #tpu.memory_space<vmem>>, %arg13: memref<128x32xf32, #tpu.memory_space<vmem>>) attributes {dimension_semantics = [#tpu.dimension_semantics<parallel>], iteration_bounds = array<i64: 2>, scalar_prefetch = 0 : i64, scratch_operands = 0 : i64, tpu.core_type = #tpu.core_type<tc>, window_params = [{transform_indices = @transform_0, window_bounds = array<i64: 128, 16>}, {pipeline_mode = #tpu.pipeline_mode<synchronous>, transform_indices = @transform_1, window_bounds = array<i64: 16, 32>}, {pipeline_mode = #tpu.pipeline_mode<synchronous>, transform_indices = @transform_2, window_bounds = array<i64: 1, 32>}, {pipeline_mode = #tpu.pipeline_mode<synchronous>, transform_indices = @transform_3, window_bounds = array<i64: 9, 32>}, {pipeline_mode = #tpu.pipeline_mode<synchronous>, transform_indices = @transform_4, window_bounds = array<i64: 1, 32>}, {pipeline_mode = #tpu.pipeline_mode<synchronous>, transform_indices = @transform_5, window_bounds = array<i64: 32, 32>}, {pipeline_mode = #tpu.pipeline_mode<synchronous>, transform_indices = @transform_6, window_bounds = array<i64: 16, 32>}, {pipeline_mode = #tpu.pipeline_mode<synchronous>, transform_indices = @transform_7, window_bounds = array<i64: 1, 32>}, {pipeline_mode = #tpu.pipeline_mode<synchronous>, transform_indices = @transform_8, window_bounds = array<i64: 128, 1>}, {pipeline_mode = #tpu.pipeline_mode<synchronous>, transform_indices = @transform_9, window_bounds = array<i64: 128, 1>}, {pipeline_mode = #tpu.pipeline_mode<synchronous>, transform_indices = @transform_10, window_bounds = array<i64: 128, 1>}, {pipeline_mode = #tpu.pipeline_mode<synchronous>, transform_indices = @transform_11, window_bounds = array<i64: 128, 1>}, {transform_indices = @transform_12, window_bounds = array<i64: 128, 32>}]} {
    %c0 = arith.constant 0 : index
    %c0_0 = arith.constant 0 : index
    %0 = vector.load %arg1[%c0, %c0_0] : memref<128x16xf32, #tpu.memory_space<vmem>>, vector<128x16xf32>
    %1 = arith.truncf %0 : vector<128x16xf32> to vector<128x16xbf16>
    %c0_1 = arith.constant 0 : index
    %c0_2 = arith.constant 0 : index
    %2 = vector.load %arg2[%c0_1, %c0_2] : memref<16x32xbf16, #tpu.memory_space<vmem>>, vector<16x32xbf16>
    %cst = arith.constant dense<0.000000e+00> : vector<128x32xf32>
    %3 = tpu.matmul %1, %2, %cst {dimension_numbers = #tpu.dot_dimension_numbers<[1], [0], [0], [1], [0, 0, 1, 1], [], []>} : vector<128x16xbf16>, vector<16x32xbf16>, vector<128x32xf32> -> vector<128x32xf32>
    %c0_3 = arith.constant 0 : index
    %c0_4 = arith.constant 0 : index
    %4 = vector.load %arg3[%c0_3, %c0_4] : memref<1x32xf32, #tpu.memory_space<vmem>>, vector<1x32xf32>
    %5 = vector.broadcast %4 : vector<1x32xf32> to vector<128x32xf32>
    %6 = arith.addf %3, %5 : vector<128x32xf32>
    %c0_5 = arith.constant 0 : index
    %c0_6 = arith.constant 0 : index
    %7 = vector.load %arg4[%c0_5, %c0_6] : memref<9x32xf32, #tpu.memory_space<vmem>>, vector<9x32xf32>
    %c1_i32 = arith.constant 1 : i32
    %8 = tpu.dynamic_rotate %6 by %c1_i32 dim 0 : vector<128x32xf32>, i32 -> vector<128x32xf32>
    %c0_7 = arith.constant 0 : index
    %c0_8 = arith.constant 0 : index
    %9 = vector.load %arg9[%c0_7, %c0_8] : memref<128x1xf32, #tpu.memory_space<vmem>>, vector<128x1xf32>
    %10 = vector.broadcast %9 : vector<128x1xf32> to vector<128x32xf32>
    %11 = arith.mulf %8, %10 : vector<128x32xf32>
    %c127_i32 = arith.constant 127 : i32
    %12 = tpu.dynamic_rotate %6 by %c127_i32 dim 0 : vector<128x32xf32>, i32 -> vector<128x32xf32>
    %c0_9 = arith.constant 0 : index
    %c0_10 = arith.constant 0 : index
    %13 = vector.load %arg10[%c0_9, %c0_10] : memref<128x1xf32, #tpu.memory_space<vmem>>, vector<128x1xf32>
    %14 = vector.broadcast %13 : vector<128x1xf32> to vector<128x32xf32>
    %15 = arith.mulf %12, %14 : vector<128x32xf32>
    %16 = vector.extract_strided_slice %7 {offsets = [0, 0], sizes = [1, 32], strides = [1, 1]} : vector<9x32xf32> to vector<1x32xf32>
    %17 = vector.shape_cast %16 : vector<1x32xf32> to vector<32xf32>
    %18 = vector.shape_cast %17 : vector<32xf32> to vector<1x32xf32>
    %19 = vector.broadcast %18 : vector<1x32xf32> to vector<128x32xf32>
    %20 = arith.mulf %19, %11 : vector<128x32xf32>
    %21 = vector.extract_strided_slice %7 {offsets = [1, 0], sizes = [1, 32], strides = [1, 1]} : vector<9x32xf32> to vector<1x32xf32>
    %22 = vector.shape_cast %21 : vector<1x32xf32> to vector<32xf32>
    %23 = vector.shape_cast %22 : vector<32xf32> to vector<1x32xf32>
    %24 = vector.broadcast %23 : vector<1x32xf32> to vector<128x32xf32>
    %25 = arith.mulf %24, %6 : vector<128x32xf32>
    %26 = arith.addf %20, %25 : vector<128x32xf32>
    %27 = vector.extract_strided_slice %7 {offsets = [2, 0], sizes = [1, 32], strides = [1, 1]} : vector<9x32xf32> to vector<1x32xf32>
    %28 = vector.shape_cast %27 : vector<1x32xf32> to vector<32xf32>
    %29 = vector.shape_cast %28 : vector<32xf32> to vector<1x32xf32>
    %30 = vector.broadcast %29 : vector<1x32xf32> to vector<128x32xf32>
    %31 = arith.mulf %30, %15 : vector<128x32xf32>
    %32 = arith.addf %26, %31 : vector<128x32xf32>
    %33 = vector.extract_strided_slice %7 {offsets = [3, 0], sizes = [1, 32], strides = [1, 1]} : vector<9x32xf32> to vector<1x32xf32>
    %34 = vector.shape_cast %33 : vector<1x32xf32> to vector<32xf32>
    %35 = vector.shape_cast %34 : vector<32xf32> to vector<1x32xf32>
    %36 = vector.broadcast %35 : vector<1x32xf32> to vector<128x32xf32>
    %37 = arith.mulf %36, %11 : vector<128x32xf32>
    %38 = vector.extract_strided_slice %7 {offsets = [4, 0], sizes = [1, 32], strides = [1, 1]} : vector<9x32xf32> to vector<1x32xf32>
    %39 = vector.shape_cast %38 : vector<1x32xf32> to vector<32xf32>
    %40 = vector.shape_cast %39 : vector<32xf32> to vector<1x32xf32>
    %41 = vector.broadcast %40 : vector<1x32xf32> to vector<128x32xf32>
    %42 = arith.mulf %41, %6 : vector<128x32xf32>
    %43 = arith.addf %37, %42 : vector<128x32xf32>
    %44 = vector.extract_strided_slice %7 {offsets = [5, 0], sizes = [1, 32], strides = [1, 1]} : vector<9x32xf32> to vector<1x32xf32>
    %45 = vector.shape_cast %44 : vector<1x32xf32> to vector<32xf32>
    %46 = vector.shape_cast %45 : vector<32xf32> to vector<1x32xf32>
    %47 = vector.broadcast %46 : vector<1x32xf32> to vector<128x32xf32>
    %48 = arith.mulf %47, %15 : vector<128x32xf32>
    %49 = arith.addf %43, %48 : vector<128x32xf32>
    %50 = vector.extract_strided_slice %7 {offsets = [6, 0], sizes = [1, 32], strides = [1, 1]} : vector<9x32xf32> to vector<1x32xf32>
    %51 = vector.shape_cast %50 : vector<1x32xf32> to vector<32xf32>
    %52 = vector.shape_cast %51 : vector<32xf32> to vector<1x32xf32>
    %53 = vector.broadcast %52 : vector<1x32xf32> to vector<128x32xf32>
    %54 = arith.mulf %53, %11 : vector<128x32xf32>
    %55 = vector.extract_strided_slice %7 {offsets = [7, 0], sizes = [1, 32], strides = [1, 1]} : vector<9x32xf32> to vector<1x32xf32>
    %56 = vector.shape_cast %55 : vector<1x32xf32> to vector<32xf32>
    %57 = vector.shape_cast %56 : vector<32xf32> to vector<1x32xf32>
    %58 = vector.broadcast %57 : vector<1x32xf32> to vector<128x32xf32>
    %59 = arith.mulf %58, %6 : vector<128x32xf32>
    %60 = arith.addf %54, %59 : vector<128x32xf32>
    %61 = vector.extract_strided_slice %7 {offsets = [8, 0], sizes = [1, 32], strides = [1, 1]} : vector<9x32xf32> to vector<1x32xf32>
    %62 = vector.shape_cast %61 : vector<1x32xf32> to vector<32xf32>
    %63 = vector.shape_cast %62 : vector<32xf32> to vector<1x32xf32>
    %64 = vector.broadcast %63 : vector<1x32xf32> to vector<128x32xf32>
    %65 = arith.mulf %64, %15 : vector<128x32xf32>
    %66 = arith.addf %60, %65 : vector<128x32xf32>
    %c8_i32 = arith.constant 8 : i32
    %67 = tpu.dynamic_rotate %32 by %c8_i32 dim 0 : vector<128x32xf32>, i32 -> vector<128x32xf32>
    %c0_11 = arith.constant 0 : index
    %c0_12 = arith.constant 0 : index
    %68 = vector.load %arg11[%c0_11, %c0_12] : memref<128x1xf32, #tpu.memory_space<vmem>>, vector<128x1xf32>
    %69 = vector.broadcast %68 : vector<128x1xf32> to vector<128x32xf32>
    %70 = arith.mulf %67, %69 : vector<128x32xf32>
    %71 = arith.addf %70, %49 : vector<128x32xf32>
    %c120_i32 = arith.constant 120 : i32
    %72 = tpu.dynamic_rotate %66 by %c120_i32 dim 0 : vector<128x32xf32>, i32 -> vector<128x32xf32>
    %c0_13 = arith.constant 0 : index
    %c0_14 = arith.constant 0 : index
    %73 = vector.load %arg12[%c0_13, %c0_14] : memref<128x1xf32, #tpu.memory_space<vmem>>, vector<128x1xf32>
    %74 = vector.broadcast %73 : vector<128x1xf32> to vector<128x32xf32>
    %75 = arith.mulf %72, %74 : vector<128x32xf32>
    %76 = arith.addf %71, %75 : vector<128x32xf32>
    %c0_15 = arith.constant 0 : index
    %c0_16 = arith.constant 0 : index
    %77 = vector.load %arg5[%c0_15, %c0_16] : memref<1x32xf32, #tpu.memory_space<vmem>>, vector<1x32xf32>
    %78 = vector.broadcast %77 : vector<1x32xf32> to vector<128x32xf32>
    %79 = arith.addf %76, %78 : vector<128x32xf32>
    %cst_17 = arith.constant 0.000000e+00 : f32
    %80 = vector.broadcast %cst_17 : f32 to vector<128x32xf32>
    %81 = arith.maximumf %79, %80 : vector<128x32xf32>
    %82 = arith.truncf %81 : vector<128x32xf32> to vector<128x32xbf16>
    %c0_18 = arith.constant 0 : index
    %c0_19 = arith.constant 0 : index
    %83 = vector.load %arg6[%c0_18, %c0_19] : memref<32x32xbf16, #tpu.memory_space<vmem>>, vector<32x32xbf16>
    %cst_20 = arith.constant dense<0.000000e+00> : vector<128x32xf32>
    %84 = tpu.matmul %82, %83, %cst_20 {dimension_numbers = #tpu.dot_dimension_numbers<[1], [0], [0], [1], [0, 0, 1, 1], [], []>} : vector<128x32xbf16>, vector<32x32xbf16>, vector<128x32xf32> -> vector<128x32xf32>
    %c0_21 = arith.constant 0 : index
    %c0_22 = arith.constant 0 : index
    %85 = vector.load %arg7[%c0_21, %c0_22] : memref<16x32xbf16, #tpu.memory_space<vmem>>, vector<16x32xbf16>
    %cst_23 = arith.constant dense<0.000000e+00> : vector<128x32xf32>
    %86 = tpu.matmul %1, %85, %cst_23 {dimension_numbers = #tpu.dot_dimension_numbers<[1], [0], [0], [1], [0, 0, 1, 1], [], []>} : vector<128x16xbf16>, vector<16x32xbf16>, vector<128x32xf32> -> vector<128x32xf32>
    %87 = arith.addf %84, %86 : vector<128x32xf32>
    %c0_24 = arith.constant 0 : index
    %c0_25 = arith.constant 0 : index
    %88 = vector.load %arg8[%c0_24, %c0_25] : memref<1x32xf32, #tpu.memory_space<vmem>>, vector<1x32xf32>
    %89 = vector.broadcast %88 : vector<1x32xf32> to vector<128x32xf32>
    %90 = arith.addf %87, %89 : vector<128x32xf32>
    %c0_26 = arith.constant 0 : index
    %c0_27 = arith.constant 0 : index
    %91 = vector.load %arg13[%c0_26, %c0_27] : memref<128x32xf32, #tpu.memory_space<vmem>>, vector<128x32xf32>
    tpu.vector_store %arg13[%c0_26, %c0_27], %90 {strides = array<i32>} : memref<128x32xf32, #tpu.memory_space<vmem>>, vector<128x32xf32>,
    return
  }
  func.func @transform_0(%arg0: i32) -> (i32, i32) {
    %c0_i32 = arith.constant 0 : i32
    %c0_i32_0 = arith.constant 0 : i32
    return %arg0, %c0_i32 : i32, i32
  }
  func.func @transform_1(%arg0: i32) -> (i32, i32) {
    %c0_i32 = arith.constant 0 : i32
    %c0_i32_0 = arith.constant 0 : i32
    %c0_i32_1 = arith.constant 0 : i32
    return %c0_i32, %c0_i32_0 : i32, i32
  }
  func.func @transform_2(%arg0: i32) -> (i32, i32) {
    %c0_i32 = arith.constant 0 : i32
    %c0_i32_0 = arith.constant 0 : i32
    %c0_i32_1 = arith.constant 0 : i32
    return %c0_i32, %c0_i32_0 : i32, i32
  }
  func.func @transform_3(%arg0: i32) -> (i32, i32) {
    %c0_i32 = arith.constant 0 : i32
    %c0_i32_0 = arith.constant 0 : i32
    %c0_i32_1 = arith.constant 0 : i32
    return %c0_i32, %c0_i32_0 : i32, i32
  }
  func.func @transform_4(%arg0: i32) -> (i32, i32) {
    %c0_i32 = arith.constant 0 : i32
    %c0_i32_0 = arith.constant 0 : i32
    %c0_i32_1 = arith.constant 0 : i32
    return %c0_i32, %c0_i32_0 : i32, i32
  }
  func.func @transform_5(%arg0: i32) -> (i32, i32) {
    %c0_i32 = arith.constant 0 : i32
    %c0_i32_0 = arith.constant 0 : i32
    %c0_i32_1 = arith.constant 0 : i32
    return %c0_i32, %c0_i32_0 : i32, i32
  }
  func.func @transform_6(%arg0: i32) -> (i32, i32) {
    %c0_i32 = arith.constant 0 : i32
    %c0_i32_0 = arith.constant 0 : i32
    %c0_i32_1 = arith.constant 0 : i32
    return %c0_i32, %c0_i32_0 : i32, i32
  }
  func.func @transform_7(%arg0: i32) -> (i32, i32) {
    %c0_i32 = arith.constant 0 : i32
    %c0_i32_0 = arith.constant 0 : i32
    %c0_i32_1 = arith.constant 0 : i32
    return %c0_i32, %c0_i32_0 : i32, i32
  }
  func.func @transform_8(%arg0: i32) -> (i32, i32) {
    %c0_i32 = arith.constant 0 : i32
    %c0_i32_0 = arith.constant 0 : i32
    %c0_i32_1 = arith.constant 0 : i32
    return %c0_i32, %c0_i32_0 : i32, i32
  }
  func.func @transform_9(%arg0: i32) -> (i32, i32) {
    %c0_i32 = arith.constant 0 : i32
    %c0_i32_0 = arith.constant 0 : i32
    %c0_i32_1 = arith.constant 0 : i32
    return %c0_i32, %c0_i32_0 : i32, i32
  }
  func.func @transform_10(%arg0: i32) -> (i32, i32) {
    %c0_i32 = arith.constant 0 : i32
    %c0_i32_0 = arith.constant 0 : i32
    %c0_i32_1 = arith.constant 0 : i32
    return %c0_i32, %c0_i32_0 : i32, i32
  }
  func.func @transform_11(%arg0: i32) -> (i32, i32) {
    %c0_i32 = arith.constant 0 : i32
    %c0_i32_0 = arith.constant 0 : i32
    %c0_i32_1 = arith.constant 0 : i32
    return %c0_i32, %c0_i32_0 : i32, i32
  }
  func.func @transform_12(%arg0: i32) -> (i32, i32) {
    %c0_i32 = arith.constant 0 : i32
    %c0_i32_0 = arith.constant 0 : i32
    return %arg0, %c0_i32 : i32, i32
  }
}

</mosaic_0001>

<bundles_post_ra>
// kernel: tpu_custom_call.1
= control target key start
LH: loop header
LB: loop body
LE: loop exit
PB: predicated region body
PF: predicated region fallthrough
CT: control target
= control target key end

     0   :  { %s2008_s21 = smov 0   ;;  %s3235_s0 = inlined_call_operand.vmem [shape: f32[256,16], index: 0, kind: input, shape index: {}]   ;;  %s3236_s1 = inlined_call_operand.vmem [shape: bf16[16,32], index: 1, kind: input, shape index: {}]   ;;  %s3237_s2 = inlined_call_operand.vmem [shape: f32[1,32], index: 2, kind: input, shape index: {}]   ;;  %s3238_s3 = inlined_call_operand.vmem [shape: f32[9,32], index: 3, kind: input, shape index: {}]   ;;  %s3239_s4 = inlined_call_operand.vmem [shape: f32[1,32], index: 4, kind: input, shape index: {}]   ;;  %s3240_s5 = inlined_call_operand.vmem [shape: bf16[32,32], index: 5, kind: input, shape index: {}]   ;;  %s3241_s6 = inlined_call_operand.vmem [shape: bf16[16,32], index: 6, kind: input, shape index: {}]   ;;  %s3242_s7 = inlined_call_operand.vmem [shape: f32[1,32], index: 7, kind: input, shape index: {}]   ;;  %s3243_s8 = inlined_call_operand.vmem [shape: f32[128,1], index: 8, kind: input, shape index: {}]   ;;  %s3244_s9 = inlined_call_operand.vmem [shape: f32[128,1], index: 9, kind: input, shape index: {}]   ;;  %s3245_s10 = inlined_call_operand.vmem [shape: f32[128,1], index: 10, kind: input, shape index: {}]   ;;  %s3246_s11 = inlined_call_operand.vmem [shape: f32[128,1], index: 11, kind: input, shape index: {}]   ;;  %s3247_s12 = inlined_call_operand.vmem [shape: f32[256,32], index: 12, kind: output, shape index: {}]  }
   0x1 LB: > { %s1790_s22 = sadd.s32 4294967295, %s1940_s21   ;;  %p1794_p0 = scmp.ge.s32.totalorder %s1940_s21, 1  ;;  %s1940_s21 = sphi %s2008_s21, %s22_s21  }
   0x2   : > { %p363_p1 = scmp.lt.s32.totalorder %s1940_s21, 3 }
   0x4   : > { %p364_p2 = pnand %p1794_p0, %p363_p1 }
   0x6   : > { %367 = sbr.rel (%p364_p2) target bundleno = 556 (0x22c), region = 68 }
   0xb   : > { %v617_v0 = vld [vmem:[%s3243_s8 + $0x8] sm:$0xff]  ;;  %v616_v1 = vld [vmem:[%s3243_s8] sm:$0xff]  ;;  %s1795_s27 = sshll.u32 %s1790_s22, 4  ;;  %v1942_v2 = vmov 0   ;;  %v618_v4 = vld [vmem:[%s3243_s8 + $0x10] sm:$0xff]  ;;  %vm457_vm0 = vcmask 130048  }
   0xc   : > { %1929 = vset.pattern.permute.xlu1 %v1942_v2  ;;  %1928 = vset.pattern.permute.xlu0 %v1942_v2  ;;  %p406_p3 = scmp.lt.s32.totalorder %s1795_s27, 31  ;;  %v1930_v3 = vld [vmem:[%s3236_s1] sm:$0xff]   ;;  %v631_v5 = vld [vmem:[%s3243_s8 + $0x78] sm:$0xff]  ;;  %v763_v32 = vld [vmem:[%s3244_s9 + $0x10] sm:$0xff]  ;;  %vm1573_vm3 = vcmask 261120  }
   0xd   : > { %639 = vperm.xlu1 %1929, %v617_v0   ;;  %634 = vperm.xlu0 %1928, %v616_v1   ;;  %v776_v6 = vld [vmem:[%s3244_s9 + $0x78] sm:$0xff]  ;;  %v761_v7 = vld [vmem:[%s3244_s9] sm:$0xff]  ;;  %v762_v33 = vld [vmem:[%s3244_s9 + $0x8] sm:$0xff] }
   0xe   : > { %s3430_s27 = smov (!%p406_p3, %s1795_s27), 31  ;;  %1861 = vmatprep.subr.bf16.mxu0 %v1930_v3  ;;  %1917 = vmatprep.subr.bf16.mxu1 %v1930_v3  ;;  %v620_v24 = vld [vmem:[%s3243_s8 + $0x20] sm:$0xff]  ;;  %v619_v25 = vld [vmem:[%s3243_s8 + $0x18] sm:$0xff]  ;;  %v1150_v38 = vld [vmem:[%s3245_s10 + $0x8] sm:$0xff] }
   0xf   : > { %1862 = vmatpush3.bf16.msra.mxu0 %v1930_v3  ;;  %1918 = vmatpush3.bf16.msra.mxu1 %v1930_v3  ;;  %s1796_s16 = sshll.u32 %s3430_s27, 3  ;;  %v765_v36 = vld [vmem:[%s3244_s9 + $0x20] sm:$0xff]  ;;  %v764_v37 = vld [vmem:[%s3244_s9 + $0x18] sm:$0xff]  ;;  %v622_v40 = vld [vmem:[%s3243_s8 + $0x30] sm:$0xff] }
  0x10   : > { %s2045_s24 = scalar_lea.vmem %s3235_s0, %s1796_s16  ;;  %v1149_v39 = vld [vmem:[%s3245_s10] sm:$0xff]  ;;  %v621_v41 = vld [vmem:[%s3243_s8 + $0x28] sm:$0xff]  ;;  %v1152_v42 = vld [vmem:[%s3245_s10 + $0x18] sm:$0xff] }
  0x11   : > { %644 = vperm.xlu1 %1929, %v618_v4   ;;  %709 = vperm.xlu0 %1928, %v631_v5   ;;  %v418_v8 = vld [vmem:[%s2045_s24] sm:$0xff]  ;;  %v419_v9 = vld [vmem:[%s2045_s24 + $0x8] sm:$0xff]  ;;  %v420_v13 = vld [vmem:[%s2045_s24 + $0x10] sm:$0xff] }
  0x12   : > { %v426_v10 = vld [vmem:[%s2045_s24 + $0x40] sm:$0xff]  ;;  %v434_v11 = vpack.c.bf16 %v419_v9, %v418_v8  ;;  %v427_v12 = vld [vmem:[%s2045_s24 + $0x48] sm:$0xff]  ;;  %v421_v14 = vld [vmem:[%s2045_s24 + $0x18] sm:$0xff] }
  0x13   : > { %v2053_v15 = vpack.c.bf16 %v427_v12, %v426_v10  ;;  %v2055_v16 = vpack.c.bf16 %v421_v14, %v420_v13  ;;  %v428_v17 = vld [vmem:[%s2045_s24 + $0x50] sm:$0xff]  ;;  %v429_v18 = vld [vmem:[%s2045_s24 + $0x58] sm:$0xff]  ;;  %v422_v19 = vld [vmem:[%s2045_s24 + $0x20] sm:$0xff] }
  0x14   : > { %v2060_v20 = vpack.c.bf16 %v429_v18, %v428_v17  ;;  %v423_v21 = vld [vmem:[%s2045_s24 + $0x28] sm:$0xff]  ;;  %v430_v22 = vld [vmem:[%s2045_s24 + $0x60] sm:$0xff]  ;;  %1863 = vmatprep.mubr.msk.bf16.mxu0 %vm457_vm0, %v434_v11  ;;  %v424_v28 = vld [vmem:[%s2045_s24 + $0x30] sm:$0xff] }
  0x15   : > { %854 = vperm.xlu1 %1929, %v776_v6   ;;  %779 = vperm.xlu0 %1928, %v761_v7   ;;  %v431_v23 = vld [vmem:[%s2045_s24 + $0x68] sm:$0xff]  ;;  %v2074_v26 = vpack.c.bf16 %v423_v21, %v422_v19  ;;  %v425_v29 = vld [vmem:[%s2045_s24 + $0x38] sm:$0xff]  ;;  %v432_v30 = vld [vmem:[%s2045_s24 + $0x70] sm:$0xff] }
  0x16   : > { %1871 = vmatprep.mubr.msk.bf16.mxu1 %vm457_vm0, %v2053_v15  ;;  %v2076_v27 = vpack.c.bf16 %v431_v23, %v430_v22  ;;  %1864 = vmatmul.mubr.msk.bf16.vlgmr.msra.gmra.mxu0 %vm457_vm0, %v2055_v16  ;;  %v433_v31 = vld [vmem:[%s2045_s24 + $0x78] sm:$0xff]  ;;  %v2096_v34 = vpack.c.bf16 %v425_v29, %v424_v28  ;;  %v1151_v43 = vld [vmem:[%s3245_s10 + $0x10] sm:$0xff]  ;;  %v1278_v44 = vld [vmem:[%s3246_s11 + $0x8] sm:$0xff]  ;;  %s3182_s24 = scalar_lea.vmem %s3247_s12, %s1796_s16 }
  0x17   : > { %1872 = vmatmul.mubr.msk.bf16.vlgmr.msra.gmra.mxu1 %vm457_vm0, %v2060_v20  ;;  %1867 = vmatprep.mubr.msk.bf16.mxu0 %vm457_vm0, %v2074_v26  ;;  %v2098_v35 = vpack.c.bf16 %v433_v31, %v432_v30  ;;  %v1277_v45 = vld [vmem:[%s3246_s11] sm:$0xff]  ;;  %v623_v47 = vld [vmem:[%s3243_s8 + $0x38] sm:$0xff]  ;;  %v767_v48 = vld [vmem:[%s3244_s9 + $0x30] sm:$0xff] }
  0x18   : > { %1875 = vmatprep.mubr.msk.bf16.mxu1 %vm457_vm0, %v2076_v27  ;;  %v624_v46 = vld [vmem:[%s3243_s8 + $0x40] sm:$0xff]  ;;  %v766_v49 = vld [vmem:[%s3244_s9 + $0x28] sm:$0xff]  ;;  %v1280_v50 = vld [vmem:[%s3246_s11 + $0x18] sm:$0xff] }
  0x19   : > { %654 = vperm.xlu1 %1929, %v620_v24   ;;  %649 = vperm.xlu0 %1928, %v619_v25   ;;  %v1279_v51 = vld [vmem:[%s3246_s11 + $0x10] sm:$0xff]  ;;  %v769_v52 = vld [vmem:[%s3244_s9 + $0x40] sm:$0xff]  ;;  %v768_v53 = vld [vmem:[%s3244_s9 + $0x38] sm:$0xff] }
  0x1a   : > { %v1154_v54 = vld [vmem:[%s3245_s10 + $0x28] sm:$0xff]  ;;  %v1153_v55 = vld [vmem:[%s3245_s10 + $0x20] sm:$0xff]  ;;  %v626_v56 = vld [vmem:[%s3243_s8 + $0x50] sm:$0xff] }
  0x1b   : > { %v625_v57 = vld [vmem:[%s3243_s8 + $0x48] sm:$0xff]  ;;  %v1156_v58 = vld [vmem:[%s3245_s10 + $0x38] sm:$0xff]  ;;  %v1155_v59 = vld [vmem:[%s3245_s10 + $0x30] sm:$0xff] }
  0x1c   : > { %v1282_v60 = vld [vmem:[%s3246_s11 + $0x28] sm:$0xff]  ;;  %v1281_v61 = vld [vmem:[%s3246_s11 + $0x20] sm:$0xff]  ;;  %v627_v63 = vld [vmem:[%s3243_s8 + $0x58] sm:$0xff] }
  0x1d   : > { %789 = vperm.xlu1 %1929, %v763_v32   ;;  %784 = vperm.xlu0 %1928, %v762_v33   ;;  %v628_v62 = vld [vmem:[%s3243_s8 + $0x60] sm:$0xff]  ;;  %v771_v0 = vld [vmem:[%s3244_s9 + $0x50] sm:$0xff]  ;;  %v770_v1 = vld [vmem:[%s3244_s9 + $0x48] sm:$0xff] }
  0x1e   : > { %1868 = vmatmul.mubr.msk.bf16.gmra.mxu0 %vm457_vm0, %v2096_v34  ;;  %v1284_v2 = vld [vmem:[%s3246_s11 + $0x38] sm:$0xff]  ;;  %v1283_v3 = vld [vmem:[%s3246_s11 + $0x30] sm:$0xff]  ;;  %v773_v4 = vld [vmem:[%s3244_s9 + $0x60] sm:$0xff] }
  0x1f   : > { %1876 = vmatmul.mubr.msk.bf16.gmra.mxu1 %vm457_vm0, %v2098_v35  ;;  %v772_v5 = vld [vmem:[%s3244_s9 + $0x58] sm:$0xff]  ;;  %v1158_v6 = vld [vmem:[%s3245_s10 + $0x48] sm:$0xff]  ;;  %v1157_v7 = vld [vmem:[%s3245_s10 + $0x40] sm:$0xff] }
  0x20   : > { %1881 = vmatprep.mubr.msk.bf16.mxu1 %vm457_vm0, %v434_v11  ;;  %v630_v8 = vld [vmem:[%s3243_s8 + $0x70] sm:$0xff]  ;;  %v629_v9 = vld [vmem:[%s3243_s8 + $0x68] sm:$0xff]  ;;  %v1160_v10 = vld [vmem:[%s3245_s10 + $0x58] sm:$0xff] }
  0x21   : > { %799 = vperm.xlu1 %1929, %v765_v36   ;;  %794 = vperm.xlu0 %1928, %v764_v37   ;;  %v1159_v11 = vld [vmem:[%s3245_s10 + $0x50] sm:$0xff]  ;;  %v1286_v12 = vld [vmem:[%s3246_s11 + $0x48] sm:$0xff]  ;;  %v1285_v13 = vld [vmem:[%s3246_s11 + $0x40] sm:$0xff] }
  0x22   : > { %v775_v14 = vld [vmem:[%s3244_s9 + $0x70] sm:$0xff]  ;;  %v774_v17 = vld [vmem:[%s3244_s9 + $0x68] sm:$0xff]  ;;  %v1288_v18 = vld [vmem:[%s3246_s11 + $0x58] sm:$0xff] }
  0x23   : > { %v1287_v19 = vld [vmem:[%s3246_s11 + $0x50] sm:$0xff]  ;;  %v1162_v21 = vld [vmem:[%s3245_s10 + $0x68] sm:$0xff]  ;;  %v1161_v22 = vld [vmem:[%s3245_s10 + $0x60] sm:$0xff] }
  0x24   : > { %v1164_v23 = vld [vmem:[%s3245_s10 + $0x78] sm:$0xff]  ;;  %v1163_v24 = vld [vmem:[%s3245_s10 + $0x70] sm:$0xff]  ;;  %v1290_v25 = vld [vmem:[%s3246_s11 + $0x68] sm:$0xff] }
  0x25   : > { %1172 = vperm.xlu1 %1929, %v1150_v38   ;;  %1167 = vperm.xlu0 %1928, %v1149_v39   ;;  %v1289_v28 = vld [vmem:[%s3246_s11 + $0x60] sm:$0xff]  ;;  %v1292_v29 = vld [vmem:[%s3246_s11 + $0x78] sm:$0xff]  ;;  %v1291_v30 = vld [vmem:[%s3246_s11 + $0x70] sm:$0xff] }
  0x29   : > { %664 = vperm.xlu1 %1929, %v622_v40   ;;  %659 = vperm.xlu0 %1928, %v621_v41  }
  0x2d   : > { %1182 = vperm.xlu1 %1929, %v1152_v42   ;;  %1177 = vperm.xlu0 %1928, %v1151_v43   ;;  %v1931_v43 = vld [vmem:[%s3241_s6] sm:$0xff]  }
  0x2e   : > { %1879 = vmatprep.subr.bf16.mxu1 %v1931_v43 }
  0x2f   : > { %1880 = vmatpush3.bf16.msra.mxu1 %v1931_v43 }
  0x31   : > { %1300 = vperm.xlu1 %1929, %v1278_v44   ;;  %1295 = vperm.xlu0 %1928, %v1277_v45   ;;  %v1932_v44 = vld [vmem:[%s3240_s5 + $0x8] sm:$0xff]  }
  0x32   : > { %1897 = vmatprep.subr.bf16.mxu0 %v1932_v44  ;;  %1882 = vmatmul.mubr.msk.bf16.vlgmr.msra.gmra.mxu1 %vm457_vm0, %v2055_v16 }
  0x33   : > { %1898 = vmatpush3.bf16.msra.mxu0 %v1932_v44  ;;  %1885 = vmatprep.mubr.msk.bf16.mxu1 %vm457_vm0, %v2074_v26 }
  0x35   : > { %674 = vperm.xlu1 %1929, %v624_v46   ;;  %669 = vperm.xlu0 %1928, %v623_v47  }
  0x39   : > { %809 = vperm.xlu1 %1929, %v767_v48   ;;  %804 = vperm.xlu0 %1928, %v766_v49   ;;  %v1933_v48 = vld [vmem:[%s3240_s5] sm:$0xff]  }
  0x3a   : > { %1899 = vmatprep.subr.bf16.mxu0 %v1933_v48  ;;  %1886 = vmatmul.mubr.msk.bf16.gmra.mxu1 %vm457_vm0, %v2096_v34 }
  0x3b   : > { %1900 = vmatpush3.bf16.msra.mxu0 %v1933_v48  ;;  %1889 = vmatprep.mubr.msk.bf16.mxu1 %vm457_vm0, %v2053_v15 }
  0x3d   : > { %1310 = vperm.xlu1 %1929, %v1280_v50   ;;  %1305 = vperm.xlu0 %1928, %v1279_v51  }
  0x41   : > { %819 = vperm.xlu1 %1929, %v769_v52   ;;  %814 = vperm.xlu0 %1928, %v768_v53  }
  0x42   : > { %1890 = vmatmul.mubr.msk.bf16.gmra.mxu1 %vm457_vm0, %v2060_v20 }
  0x43   : > { %1893 = vmatprep.mubr.msk.bf16.mxu1 %vm457_vm0, %v2076_v27 }
  0x45   : > { %1192 = vperm.xlu1 %1929, %v1154_v54   ;;  %1187 = vperm.xlu0 %1928, %v1153_v55  }
  0x49   : > { %684 = vperm.xlu1 %1929, %v626_v56   ;;  %679 = vperm.xlu0 %1928, %v625_v57  }
  0x4a   : > { %1894 = vmatmul.mubr.msk.bf16.gmra.mxu1 %vm457_vm0, %v2098_v35  ;;  %v597_v35 = vlaneseq }
  0x4d   : > { %1202 = vperm.xlu1 %1929, %v1156_v58   ;;  %1197 = vperm.xlu0 %1928, %v1155_v59  }
  0x51   : > { %1320 = vperm.xlu1 %1929, %v1282_v60   ;;  %1315 = vperm.xlu0 %1928, %v1281_v61  }
  0x55   : > { %694 = vperm.xlu1 %1929, %v628_v62   ;;  %689 = vperm.xlu0 %1928, %v627_v63   ;;  %v2352_v63 = vshrl.u32 %v597_v35, 7 }
  0x57   : > { %vm599_vm1 = vcmp.lt.s32.totalorder %v2352_v63, 1  ;;  %vm744_vm2 = vcmp.lt.s32.totalorder %v2352_v63, 7 }
  0x59   : > { %829 = vperm.xlu1 %1929, %v771_v0   ;;  %824 = vperm.xlu0 %1928, %v770_v1  }
  0x5d   : > { %1330 = vperm.xlu1 %1929, %v1284_v2   ;;  %1325 = vperm.xlu0 %1928, %v1283_v3  }
  0x61   : > { %839 = vperm.xlu1 %1929, %v773_v4   ;;  %834 = vperm.xlu0 %1928, %v772_v5   ;;  %v2359_v4 = vld [vmem:[%s3237_s2] ss:$0 sm:$0xff]  ;;  %v895_v5 = vsub.s32 1, %v2352_v63 }
  0x65   : > { %1212 = vperm.xlu1 %1929, %v1158_v6   ;;  %1207 = vperm.xlu0 %1928, %v1157_v7   ;;  %v579_v6 = vld [vmem:[%s3238_s3] sm:$0xff]  ;;  %v987_v7 = vsub.s32 4, %v2352_v63 }
  0x69   : > { %704 = vperm.xlu1 %1929, %v630_v8   ;;  %699 = vperm.xlu0 %1928, %v629_v9   ;;  %v1079_v8 = vsub.s32 7, %v2352_v63 }
  0x6d   : > { %1222 = vperm.xlu1 %1929, %v1160_v10   ;;  %1217 = vperm.xlu0 %1928, %v1159_v11  }
  0x71   : > { %1340 = vperm.xlu1 %1929, %v1286_v12   ;;  %1335 = vperm.xlu0 %1928, %v1285_v13  }
  0x75   : > { %849 = vperm.xlu1 %1929, %v775_v14   ;;  %844 = vperm.xlu0 %1928, %v774_v17   ;;  %v875_v17 = vsub.s32 0, %v2352_v63 }
  0x79   : > { %1350 = vperm.xlu1 %1929, %v1288_v18   ;;  %1345 = vperm.xlu0 %1928, %v1287_v19   ;;  %v931_v18 = vsub.s32 2, %v2352_v63 }
  0x7b   : > { %v2402_v35 = vrot.slane %v579_v6, %v931_v18 }
  0x7d   : > { %1232 = vperm.xlu1 %1929, %v1162_v21   ;;  %1227 = vperm.xlu0 %1928, %v1161_v22   ;;  %v2382_v21 = vrot.slane %v579_v6, %v895_v5  ;;  %v967_v22 = vsub.s32 3, %v2352_v63  ;;  %3293 = vst [vmem:[#allocation20_spill] sm:$0xff] %v2402_v35 }
  0x81   : > { %1242 = vperm.xlu1 %1929, %v1164_v23   ;;  %1237 = vperm.xlu0 %1928, %v1163_v24   ;;  %v1023_v23 = vsub.s32 5, %v2352_v63 }
  0x83   : > { %v2413_v44 = vrot.slane %v579_v6, %v1023_v23 }
  0x85   : > { %1360 = vperm.xlu1 %1929, %v1290_v25   ;;  %1355 = vperm.xlu0 %1928, %v1289_v28   ;;  %v2388_v25 = vrot.slane %v579_v6, %v987_v7  ;;  %v2390_v28 = vrot.slane %v579_v6, %v1079_v8  ;;  %v2411_v8 = vrot.slane %v579_v6, %v967_v22 }
  0x87   : > { %3292 = vst [vmem:[#allocation19_spill] sm:$0xff] %v2390_v28 }
  0x88   : > { %v2267_v31 = vpop.permute.xlu1 %639  ;;  %v2269_v32 = vpop.permute.xlu0 %634 }
  0x89   : > { %1370 = vperm.xlu1 %1929, %v1292_v29   ;;  %1365 = vperm.xlu0 %1928, %v1291_v30   ;;  %v1059_v30 = vsub.s32 6, %v2352_v63 }
  0x8b   : > { %v2421_v18 = vrot.slane %v579_v6, %v1059_v30 }
  0x8c   : > { %v2271_v33 = vpop.permute.xlu1 %644  ;;  %v2273_v36 = vpop.permute.xlu0 %709 }
  0x8d   : > { %3275 = vst [vmem:[#allocation2_spill] sm:$0xff] %v2273_v36 }
  0x90   : > { %v2275_v37 = vpop.permute.xlu1 %854  ;;  %v2277_v38 = vpop.permute.xlu0 %779 }
  0x91   : > { %3276 = vst [vmem:[#allocation3_spill] sm:$0xff] %v2275_v37 }
  0x94   : > { %v2279_v39 = vpop.permute.xlu0 %649  ;;  %v2281_v40 = vpop.permute.xlu1 %654 }
  0x98   : > { %v2283_v41 = vpop.permute.xlu0 %784  ;;  %v2285_v42 = vpop.permute.xlu1 %789 }
  0x9c   : > { %v2293_v45 = vpop.permute.xlu0 %794  ;;  %v2295_v46 = vpop.permute.xlu1 %799 }
  0xa0   : > { %v2301_v47 = vpop.permute.xlu0 %1167  ;;  %v2306_v49 = vpop.permute.xlu1 %1172 }
  0xa1   : > { %3277 = vst [vmem:[#allocation4_spill] sm:$0xff] %v2301_v47  ;;  %3278 = vst [vmem:[#allocation5_spill] sm:$0xff] %v2306_v49 }
  0xa4   : > { %v2310_v50 = vpop.permute.xlu0 %659  ;;  %v2314_v16 = vpop.permute.xlu1 %664 }
  0xa8   : > { %v2316_v26 = vpop.permute.xlu0 %1177  ;;  %v2322_v51 = vpop.permute.xlu1 %1182 }
  0xa9   : > { %3279 = vst [vmem:[#allocation6_spill] sm:$0xff] %v2322_v51 }
  0xac   : > { %v2324_v52 = vpop.permute.xlu0 %1295  ;;  %v2326_v34 = vpop.permute.xlu1 %1300 }
  0xad   : > { %3280 = vst [vmem:[#allocation7_spill] sm:$0xff] %v2324_v52  ;;  %3281 = vst [vmem:[#allocation8_spill] sm:$0xff] %v2326_v34 }
  0xb0   : > { %v2330_v15 = vpop.permute.xlu0 %669  ;;  %v2332_v53 = vpop.permute.xlu1 %674 }
  0xb4   : > { %v2334_v54 = vpop.permute.xlu0 %804  ;;  %v2336_v55 = vpop.permute.xlu1 %809 }
  0xb8   : > { %v2338_v20 = vpop.permute.xlu0 %1305  ;;  %v2340_v27 = vpop.permute.xlu1 %1310 }
  0xb9   : > { %3282 = vst [vmem:[#allocation9_spill] sm:$0xff] %v2338_v20  ;;  %3283 = vst [vmem:[#allocation10_spill] sm:$0xff] %v2340_v27 }
  0xbc   : > { %v2342_v56 = vpop.permute.xlu0 %814  ;;  %v2344_v57 = vpop.permute.xlu1 %819 }
  0xbd   : > { %3284 = vst [vmem:[#allocation11_spill] sm:$0xff] %v2342_v56  ;;  %3285 = vst [vmem:[#allocation12_spill] sm:$0xff] %v2344_v57 }
  0xc0   : > { %v2346_v58 = vpop.permute.xlu0 %1187  ;;  %v2348_v60 = vpop.permute.xlu1 %1192 }
  0xc1   : > { %3286 = vst [vmem:[#allocation13_spill] sm:$0xff] %v2346_v58  ;;  %3287 = vst [vmem:[#allocation14_spill] sm:$0xff] %v2348_v60 }
  0xc4   : > { %v2350_v62 = vpop.permute.xlu0 %679  ;;  %v2354_v2 = vpop.permute.xlu1 %684 }
  0xc5   : > { %3288 = vst [vmem:[#allocation15_spill] sm:$0xff] %v2350_v62 }
  0xc8   : > { %v2373_v11 = vpop.permute.xlu0 %1197  ;;  %v2386_v24 = vpop.permute.xlu1 %1202 }
  0xc9   : > { %3290 = vst [vmem:[#allocation17_spill] sm:$0xff] %v2373_v11  ;;  %3291 = vst [vmem:[#allocation18_spill] sm:$0xff] %v2386_v24 }
  0xd6   : > { %v1865_v59 = vpop.f32.mrf.mxu0 }
  0xd7   : > { %v1873_v3 = vpop.f32.mrf.mxu1  ;;  %v525_v12 = vadd.f32 %v1865_v59, %v2359_v4  ;;  %v2400_v59 = vrot.slane %v579_v6, %v875_v17 }
  0xd8   : > { %v516_v61 = vpop.f32.mrf.mxu0  ;;  %v2398_v48 = vadd.f32 %v1873_v3, %v2359_v4 }
  0xd9   : > { %v2368_v9 = vadd.f32 %v2359_v4, %v516_v61  ;;  %v548_v14 = vpop.f32.mrf.mxu1  ;;  %v583_v43 = vrot.slane %v525_v12, 7  ;;  %v730_v5 = vrot.slane %v525_v12, 1  ;;  %v2416_v3 = vmul.f32 %v2382_v21, %v525_v12 }
  0xda   : > { %v1866_v0 = vpop.f32.mrf.mxu0  ;;  %v2419_v17 = vadd.f32 %v2359_v4, %v548_v14  ;;  %v2425_v11 = vmul.f32 %v2388_v25, %v525_v12  ;;  %v2428_v7 = vmul.f32 %v2390_v28, %v525_v12  ;;  %v2435_v14 = vpop.permute.xlu1 %1320  ;;  %v2444_v12 = vmul.f32 %v2382_v21, %v2398_v48 }
  0xdb   : > { %3289 = vst [vmem:[#allocation16_spill] sm:$0xff] %v2368_v9  ;;  %v2377_v13 = vadd.f32 %v1866_v0, %v2359_v4  ;;  %v3248_v29 = vrot.slane %v2368_v9, 7  ;;  %v1874_v61 = vpop.f32.mrf.mxu1  ;;  %3297 = vst [vmem:[#allocation23_spill] sm:$0xff] %v2435_v14  ;;  %v2459_v30 = vmul.f32 %v2388_v25, %v2368_v9 }
  0xdc   : > { %v519_v1 = vpop.f32.mrf.mxu0  ;;  %3295 = vst [vmem:[#allocation22_spill] sm:$0xff] %v2428_v7  ;;  %v2440_v60 = vadd.f32 %v1874_v61, %v2359_v4  ;;  %3298 = vst [vmem:[#allocation24_spill] sm:$0xff] %v2444_v12 }
  0xdd   : > { %v2371_v10 = vadd.f32 %v2359_v4, %v519_v1  ;;  %v2408_v1 = vpop.permute.xlu0 %1315  ;;  %v3296_v22 = vrot.slane %v2377_v13, 7  ;;  %v551_v58 = vpop.f32.mrf.mxu1  ;;  %3301 = vst [vmem:[#allocation26_spill] sm:$0xff] %v2459_v30 }
  0xde   : > { %3294 = vst [vmem:[#allocation21_spill] sm:$0xff] %v2408_v1 }
  0xdf   : > { %v582_v19 = vrot.slane %v2371_v10, 7  ;;  %v729_v24 = vrot.slane %v2371_v10, 1  ;;  %v612_v23 = vsel %vm599_vm1, %v583_v43, %v3296_v22  ;;  %v2449_v22 = vmul.f32 %v2382_v21, %v2368_v9  ;;  %v1877_v20 = vpop.f32.mrf.mxu1 }
  0xe0   : > { %v715_v34 = vmul.f32 %v2279_v39, %v612_v23  ;;  %v992_v39 = vmul.f32 %v2388_v25, %v2377_v13 }
  0xe1   : > { %v614_v0 = vsel %vm599_vm1, %v3248_v29, %v582_v19  ;;  %v1869_v29 = vpop.f32.mrf.mxu0  ;;  %3299 = vst [vmem:[#allocation25_spill] sm:$0xff] %v2449_v22  ;;  %v613_v61 = vsel %vm599_vm1, %v582_v19, %v583_v43  ;;  %v758_v14 = vsel %vm744_vm2, %v729_v24, %v730_v5  ;;  %v2465_v27 = vpop.permute.xlu0 %689  ;;  %v900_v19 = vmul.f32 %v2382_v21, %v2377_v13 }
  0xe2   : > { %v713_v1 = vmul.f32 %v2267_v31, %v614_v0  ;;  %v3300_v31 = vrot.slane %v2377_v13, 1  ;;  %v2483_v23 = vmul.f32 %v2271_v33, %v613_v61  ;;  %v2488_v49 = vmul.f32 %v2283_v41, %v758_v14  ;;  %v564_v36 = vpop.f32.mrf.mxu1 }
  0xe3   : > { %v532_v52 = vpop.f32.mrf.mxu0  ;;  %v880_v47 = vmul.f32 %v2400_v59, %v715_v34  ;;  %v972_v7 = vmul.f32 %v2411_v8, %v715_v34  ;;  %v2497_v33 = vadd.f32 %v2359_v4, %v551_v58  ;;  %v1064_v51 = vmul.f32 %v2421_v18, %v715_v34 }
  0xe4   : > { %v757_v0 = vsel %vm744_vm2, %v730_v5, %v3300_v31  ;;  %v2470_v31 = vmul.f32 %v2390_v28, %v2419_v17  ;;  %v878_v43 = vmul.f32 %v2400_v59, %v713_v1  ;;  %v1084_v5 = vmul.f32 %v2390_v28, %v2377_v13  ;;  %3304 = vst [vmem:[#allocation29_spill] sm:$0xff] %v2483_v23 }
  0xe5   : > { %v2476_v6 = vmul.f32 %v2285_v42, %v757_v0  ;;  %3305 = vst [vmem:[#allocation30_spill] sm:$0xff] %v2488_v49  ;;  %v898_v42 = vmul.f32 %v2382_v21, %v2371_v10  ;;  %v2492_v0 = vpop.permute.xlu1 %694  ;;  %v2500_v61 = vadd.f32 %v2359_v4, %v532_v52  ;;  %v990_v14 = vmul.f32 %v2388_v25, %v2371_v10  ;;  %v2515_v34 = vpop.permute.xlu0 %824 }
  0xe6   : > { %3302 = vst [vmem:[#allocation27_spill] sm:$0xff] %v2470_v31  ;;  %3306 = vst [vmem:[#allocation31_spill] sm:$0xff] %v2492_v0  ;;  %v1870_v31 = vpop.f32.mrf.mxu0  ;;  %v2506_v30 = vadd.f32 %v1869_v29, %v2359_v4  ;;  %v879_v52 = vmul.f32 %v2400_v59, %v2483_v23  ;;  %v970_v37 = vmul.f32 %v2411_v8, %v713_v1 }
  0xe7   : > { %3303 = vst [vmem:[#allocation28_spill] sm:$0xff] %v2476_v6  ;;  %v914_v41 = vadd.f32 %v898_v42, %v878_v43  ;;  %v935_v22 = vmul.f32 %v2402_v35, %v2476_v6  ;;  %v1027_v58 = vmul.f32 %v2413_v44, %v2476_v6  ;;  %3307 = vst [vmem:[#allocation32_spill] sm:$0xff] %v2515_v34  ;;  %v3308_v43 = vrot.slane %v2368_v9, 1 }
  0xe8   : > { %v934_v42 = vmul.f32 %v2402_v35, %v2488_v49  ;;  %v971_v0 = vmul.f32 %v2411_v8, %v2483_v23  ;;  %v2526_v6 = vadd.f32 %v1870_v31, %v2359_v4  ;;  %v2528_v12 = vadd.f32 %v900_v19, %v880_v47  ;;  %v535_v23 = vpop.f32.mrf.mxu0 }
  0xe9   : > { %v759_v29 = vsel %vm744_vm2, %v3308_v43, %v729_v24  ;;  %v2530_v56 = vadd.f32 %v992_v39, %v972_v7  ;;  %v1062_v34 = vmul.f32 %v2421_v18, %v713_v1  ;;  %v585_v57 = vrot.slane %v2500_v61, 7  ;;  %v2539_v35 = vpop.permute.xlu1 %829 }
  0xea   : > { %3309 = vst [vmem:[#allocation33_spill] sm:$0xff] %v2528_v12  ;;  %v2534_v62 = vadd.f32 %v1084_v5, %v1064_v51  ;;  %v950_v24 = vadd.f32 %v934_v42, %v914_v41  ;;  %v1082_v43 = vmul.f32 %v2390_v28, %v2371_v10  ;;  %v3256_v49 = vrot.slane %v2500_v61, 1  ;;  %v1878_v51 = vpop.f32.mrf.mxu1 }
  0xeb   : > { %v2542_v47 = vmul.f32 %v2277_v38, %v759_v29  ;;  %v915_v7 = vadd.f32 %v2416_v3, %v879_v52  ;;  %v2545_v31 = vadd.f32 %v990_v14, %v970_v37  ;;  %v1007_v19 = vadd.f32 %v2425_v11, %v971_v0  ;;  %v2564_v11 = vpop.permute.xlu0 %1325 }
  0xec   : > { %v3255_v10 = vrot.slane %v2506_v30, 7  ;;  %v588_v5 = vrot.slane %v2526_v6, 7  ;;  %v2552_v41 = vadd.f32 %v1082_v43, %v1062_v34  ;;  %v2555_v38 = vadd.f32 %v1877_v20, %v2359_v4  ;;  %3314 = vst [vmem:[#allocation37_spill] sm:$0xff] %v2564_v11  ;;  %v567_v43 = vpop.f32.mrf.mxu1 }
  0xed   : > { %3310 = vst [vmem:[#allocation34_spill] sm:$0xff] %v2542_v47  ;;  %3311 = vst [vmem:[#allocation35_spill] sm:$0xff] %v2545_v31  ;;  %v3313_v3 = vrot.slane %v2377_v13, 7  ;;  %v2562_v14 = vadd.f32 %v2359_v4, %v535_v23  ;;  %v1247_v0 = vmul.f32 %v2316_v26, %v950_v24  ;;  %v734_v52 = vrot.slane %v2506_v30, 1 }
  0xee   : > { %3312 = vst [vmem:[#allocation36_spill] sm:$0xff] %v2552_v41  ;;  %v2570_v34 = vmul.f32 %v2382_v21, %v2506_v30  ;;  %v3316_v20 = vrot.slane %v2377_v13, 1  ;;  %v2578_v42 = vadd.f32 %v935_v22, %v915_v7  ;;  %v2582_v23 = vmul.f32 %v2388_v25, %v2506_v30  ;;  %v2596_v7 = vpop.permute.xlu1 %1330 }
  0xef   : > { %v611_v37 = vsel %vm599_vm1, %v3313_v3, %v585_v57  ;;  %v2585_v26 = vadd.f32 %v2359_v4, %v564_v36  ;;  %v2588_v24 = vadd.f32 %v1878_v51, %v2359_v4  ;;  %v1043_v3 = vadd.f32 %v1027_v58, %v1007_v19  ;;  %3319 = vst [vmem:[#allocation41_spill] sm:$0xff] %v2596_v7 }
  0xf0   : > { %3315 = vst [vmem:[#allocation38_spill] sm:$0xff] %v2570_v34  ;;  %v756_v29 = vsel %vm744_vm2, %v3316_v20, %v3256_v49  ;;  %3317 = vst [vmem:[#allocation39_spill] sm:$0xff] %v2578_v42  ;;  %v716_v39 = vmul.f32 %v2281_v40, %v611_v37  ;;  %v608_v13 = vsel %vm599_vm1, %v3255_v10, %v588_v5  ;;  %v3257_v22 = vrot.slane %v2526_v6, 1 }
  0xf1   : > { %3318 = vst [vmem:[#allocation40_spill] sm:$0xff] %v2582_v23  ;;  %v2600_v36 = vmul.f32 %v2390_v28, %v2506_v30  ;;  %v2604_v20 = vmul.f32 %v2293_v45, %v756_v29  ;;  %v586_v40 = vrot.slane %v2562_v14, 7  ;;  %v2607_v58 = vadd.f32 %v1247_v0, %v1043_v3  ;;  %v2623_v29 = vpop.permute.xlu0 %834  ;;  %v2628_v3 = vld [vmem:[%s3238_s3 + $0x8] ss:$0 sm:$0xff] }
  0xf2   : > { %v901_v19 = vmul.f32 %v2382_v21, %v2500_v61  ;;  %v993_v37 = vmul.f32 %v2388_v25, %v2500_v61  ;;  %v2614_v1 = vadd.f32 %v2359_v4, %v567_v43  ;;  %v1085_v10 = vmul.f32 %v2390_v28, %v2500_v61 }
  0xf3   : > { %3320 = vst [vmem:[#allocation42_spill] sm:$0xff] %v2600_v36  ;;  %3321 = vst [vmem:[#allocation43_spill] sm:$0xff] %v2604_v20  ;;  %v2620_v45 = vmul.f32 %v2330_v15, %v608_v13  ;;  %v881_v4 = vmul.f32 %v2400_v59, %v716_v39  ;;  %v973_v43 = vmul.f32 %v2411_v8, %v716_v39  ;;  %v733_v15 = vrot.slane %v2562_v14, 1 }
  0xf4   : > { %3322 = vst [vmem:[#allocation44_spill] sm:$0xff] %v2607_v58  ;;  %v753_v51 = vsel %vm744_vm2, %v734_v52, %v3257_v22  ;;  %v1028_v13 = vmul.f32 %v2413_v44, %v2604_v20  ;;  %v1065_v49 = vmul.f32 %v2421_v18, %v716_v39  ;;  %v1120_v0 = vmul.f32 %v2628_v3, %v2604_v20  ;;  %v2653_v39 = vpop.permute.xlu1 %839 }
  0xf5   : > { %v610_v7 = vsel %vm599_vm1, %v585_v57, %v586_v40  ;;  %v3323_v23 = vrot.slane %v2419_v17, 7  ;;  %v996_v34 = vmul.f32 %v2388_v25, %v2526_v6  ;;  %v1088_v36 = vmul.f32 %v2390_v28, %v2526_v6 }
  0xf6   : > { %v2656_v12 = vmul.f32 %v2336_v55, %v753_v51  ;;  %v976_v57 = vmul.f32 %v2411_v8, %v2620_v45  ;;  %v1068_v11 = vmul.f32 %v2421_v18, %v2620_v45  ;;  %v3325_v58 = vrot.slane %v2368_v9, 7 }
  0xf7   : > { %v607_v22 = vsel %vm599_vm1, %v588_v5, %v3323_v23  ;;  %v3326_v5 = vrot.slane %v2588_v24, 7  ;;  %v2668_v20 = vadd.f32 %v901_v19, %v881_v4  ;;  %v2670_v42 = vadd.f32 %v993_v37, %v973_v43  ;;  %v2685_v19 = vpop.permute.xlu0 %1207 }
  0xf8   : > { %3324 = vst [vmem:[#allocation45_spill] sm:$0xff] %v2656_v12  ;;  %v717_v55 = vmul.f32 %v2310_v50, %v610_v7  ;;  %v3329_v51 = vrot.slane %v2500_v61, 1  ;;  %v2678_v41 = vadd.f32 %v1028_v13, %v2530_v56  ;;  %v1101_v31 = vadd.f32 %v1085_v10, %v1065_v49 }
  0xf9   : > { %v615_v23 = vsel %vm599_vm1, %v3326_v5, %v3325_v58  ;;  %3327 = vst [vmem:[#allocation46_spill] sm:$0xff] %v2668_v20  ;;  %3328 = vst [vmem:[#allocation47_spill] sm:$0xff] %v2670_v42  ;;  %v2681_v47 = vadd.f32 %v1120_v0, %v2534_v62  ;;  %v754_v58 = vsel %vm744_vm2, %v733_v15, %v734_v52  ;;  %v3331_v61 = vrot.slane %v2506_v30, 7 }
  0xfa   : > { %v755_v12 = vsel %vm744_vm2, %v3329_v51, %v733_v15  ;;  %v2688_v37 = vmul.f32 %v2269_v32, %v615_v23  ;;  %v2692_v50 = vmul.f32 %v2382_v21, %v2588_v24  ;;  %v902_v56 = vmul.f32 %v2382_v21, %v2562_v14 }
  0xfb   : > { %v609_v49 = vsel %vm599_vm1, %v586_v40, %v3331_v61  ;;  %v2700_v62 = vadd.f32 %v996_v34, %v976_v57  ;;  %v2702_v10 = vadd.f32 %v1088_v36, %v1068_v11  ;;  %v2705_v52 = vmul.f32 %v2295_v46, %v755_v12  ;;  %v2726_v36 = vpop.permute.xlu1 %1212 }
  0xfc   : > { %3330 = vst [vmem:[#allocation48_spill] sm:$0xff] %v2688_v37  ;;  %v3334_v32 = vrot.slane %v2398_v48, 7  ;;  %v3335_v7 = vrot.slane %v2497_v33, 7  ;;  %v2714_v0 = vmul.f32 %v2334_v54, %v754_v58  ;;  %v882_v40 = vmul.f32 %v2400_v59, %v717_v55 }
  0xfd   : > { %3332 = vst [vmem:[#allocation49_spill] sm:$0xff] %v2700_v62  ;;  %3333 = vst [vmem:[#allocation50_spill] sm:$0xff] %v2702_v10  ;;  %v3337_v34 = vrot.slane %v2440_v60, 7  ;;  %v2724_v12 = vmul.f32 %v2332_v53, %v607_v22  ;;  %v2729_v4 = vmul.f32 %v2314_v16, %v609_v49  ;;  %v974_v54 = vmul.f32 %v2411_v8, %v717_v55  ;;  %v3359_v62 = vld [vmem:[#allocation11_spill] sm:$0xff] }
  0xfe   : > { %v605_v30 = vsel %vm599_vm1, %v3335_v7, %v3334_v32  ;;  %3336 = vst [vmem:[#allocation51_spill] sm:$0xff] %v2714_v0  ;;  %v3338_v11 = vmov %v3334_v32  ;;  %v994_v43 = vmul.f32 %v2388_v25, %v2562_v14  ;;  %v1086_v15 = vmul.f32 %v2390_v28, %v2562_v14 }
  0xff   : > { %v604_v46 = vsel %vm599_vm1, %v3338_v11, %v3337_v34  ;;  %3339 = vst [vmem:[#allocation52_spill] sm:$0xff] %v2724_v12  ;;  %3340 = vst [vmem:[#allocation53_spill] sm:$0xff] %v2729_v4  ;;  %v722_v57 = vmul.f32 %v2354_v2, %v605_v30  ;;  %v3341_v53 = vrot.slane %v2440_v60, 1  ;;  %v3342_v22 = vrot.slane %v2398_v48, 1  ;;  %v3347_v34 = vld [vmem:[#allocation20_spill] sm:$0xff] }
 0x100   : > { %v3343_v5 = vmov %v3335_v7  ;;  %v3344_v23 = vrot.slane %v2419_v17, 7  ;;  %v1066_v14 = vmul.f32 %v2421_v18, %v717_v55  ;;  %v1121_v58 = vmul.f32 %v2628_v3, %v2705_v52  ;;  %v2762_v7 = vpop.permute.xlu0 %699 }
 0x101   : > { %v749_v16 = vsel %vm744_vm2, %v3342_v22, %v3341_v53  ;;  %v2754_v2 = vmul.f32 %v2465_v27, %v604_v46  ;;  %v3345_v61 = vrot.slane %v2497_v33, 1  ;;  %v3346_v49 = vrot.slane %v2419_v17, 1 }
 0x102   : > { %v606_v51 = vsel %vm599_vm1, %v3344_v23, %v3343_v5  ;;  %v918_v30 = vadd.f32 %v902_v56, %v882_v40  ;;  %v938_v11 = vmul.f32 %v3347_v34, %v2714_v0  ;;  %v3348_v55 = vrot.slane %v2585_v26, 1  ;;  %v3350_v23 = vld [vmem:[#allocation15_spill] sm:$0xff] }
 0x103   : > { %v751_v32 = vsel %vm744_vm2, %v3346_v49, %v3345_v61  ;;  %v885_v46 = vmul.f32 %v2400_v59, %v2724_v12  ;;  %v2774_v22 = vadd.f32 %v994_v43, %v974_v54  ;;  %v2777_v5 = vmul.f32 %v2539_v35, %v749_v16  ;;  %v2794_v43 = vpop.permute.xlu1 %704 }
 0x104   : > { %v748_v27 = vsel %vm744_vm2, %v3341_v53, %v3348_v55  ;;  %v721_v56 = vmul.f32 %v3350_v23, %v606_v51  ;;  %v3351_v40 = vmov %v3346_v49  ;;  %v3352_v61 = vrot.slane %v2526_v6, 1  ;;  %v3353_v55 = vld [vmem:[#allocation12_spill] sm:$0xff] }
 0x105   : > { %3349 = vst [vmem:[#allocation20_spill] sm:$0xff] %v2774_v22  ;;  %v887_v13 = vmul.f32 %v2400_v59, %v722_v57  ;;  %v2788_v53 = vmul.f32 %v3353_v55, %v751_v32  ;;  %v905_v54 = vmul.f32 %v2382_v21, %v2419_v17  ;;  %v884_v35 = vmul.f32 %v2400_v59, %v2620_v45 }
 0x106   : > { %v752_v49 = vsel %vm744_vm2, %v3352_v61, %v3351_v40  ;;  %3355 = vst [vmem:[#allocation12_spill] sm:$0xff] %v2794_v43  ;;  %v2796_v16 = vadd.f32 %v1086_v15, %v1066_v14  ;;  %v2798_v51 = vadd.f32 %v1121_v58, %v1101_v31  ;;  %v2801_v23 = vmul.f32 %v2623_v29, %v748_v27  ;;  %v3362_v27 = vld [vmem:[#allocation24_spill] sm:$0xff] }
 0x107   : > { %3354 = vst [vmem:[#allocation15_spill] sm:$0xff] %v2788_v53  ;;  %v980_v40 = vmul.f32 %v2411_v8, %v2754_v2  ;;  %v3357_v32 = vrot.slane %v2398_v48, 1  ;;  %v3358_v61 = vrot.slane %v2497_v33, 1  ;;  %v921_v45 = vadd.f32 %v905_v54, %v885_v46  ;;  %v1218_v54 = vpop.permute.xlu0 %1217 }
 0x108   : > { %3356 = vst [vmem:[#allocation54_spill] sm:$0xff] %v2796_v16  ;;  %v2812_v10 = vmul.f32 %v3359_v62, %v752_v49  ;;  %v904_v31 = vmul.f32 %v2382_v21, %v2526_v6  ;;  %v2816_v15 = vadd.f32 %v938_v11, %v918_v30  ;;  %v943_v29 = vmul.f32 %v3347_v34, %v2777_v5  ;;  %v3363_v6 = vld [vmem:[#allocation32_spill] sm:$0xff] }
 0x109   : > { %v750_v55 = vsel %vm744_vm2, %v3358_v61, %v3357_v32  ;;  %v886_v14 = vmul.f32 %v2400_v59, %v721_v56  ;;  %v978_v58 = vmul.f32 %v2411_v8, %v721_v56  ;;  %v923_v43 = vadd.f32 %v3362_v27, %v887_v13 }
 0x10a   : > { %3360 = vst [vmem:[#allocation11_spill] sm:$0xff] %v2812_v10  ;;  %3361 = vst [vmem:[#allocation55_spill] sm:$0xff] %v2816_v15  ;;  %v1000_v46 = vmul.f32 %v2388_v25, %v2440_v60  ;;  %v941_v62 = vmul.f32 %v3347_v34, %v2788_v53  ;;  %v920_v49 = vadd.f32 %v904_v31, %v884_v35  ;;  %v1223_v31 = vpop.permute.xlu1 %1222 }
 0x10b   : > { %v866_v30 = vmul.f32 %v3363_v6, %v750_v55  ;;  %v906_v11 = vmul.f32 %v2382_v21, %v2497_v33  ;;  %v998_v32 = vmul.f32 %v2388_v25, %v2497_v33  ;;  %v1071_v61 = vmul.f32 %v2421_v18, %v722_v57 }
 0x10c   : > { %v1036_v13 = vmul.f32 %v2413_v44, %v2801_v23  ;;  %v957_v27 = vadd.f32 %v941_v62, %v921_v45  ;;  %v940_v15 = vmul.f32 %v3347_v34, %v2812_v10  ;;  %v977_v35 = vmul.f32 %v2411_v8, %v2724_v12 }
 0x10d   : > { %v1016_v55 = vadd.f32 %v1000_v46, %v980_v40  ;;  %v922_v6 = vadd.f32 %v906_v11, %v886_v14  ;;  %v1014_v16 = vadd.f32 %v998_v32, %v978_v58  ;;  %v1091_v22 = vmul.f32 %v2390_v28, %v2398_v48  ;;  %v1336_v14 = vpop.permute.xlu0 %1335 }
 0x10e   : > { %v979_v4 = vmul.f32 %v2411_v8, %v722_v57  ;;  %v956_v42 = vadd.f32 %v940_v15, %v920_v49  ;;  %v997_v0 = vmul.f32 %v2388_v25, %v2419_v17  ;;  %v1070_v45 = vmul.f32 %v2421_v18, %v721_v56 }
 0x10f   : > { %v959_v62 = vadd.f32 %v943_v29, %v923_v43  ;;  %v942_v10 = vmul.f32 %v3347_v34, %v866_v30  ;;  %v1034_v12 = vmul.f32 %v2413_v44, %v866_v30  ;;  %v1107_v20 = vadd.f32 %v1091_v22, %v1071_v61 }
 0x110   : > { %v1254_v40 = vmul.f32 %v2726_v36, %v957_v27  ;;  %v1013_v58 = vadd.f32 %v997_v0, %v977_v35  ;;  %v1090_v46 = vmul.f32 %v2390_v28, %v2497_v33  ;;  %v741_v57 = vrot.slane %v2614_v1, 1 }
 0x111   : > { %v958_v15 = vadd.f32 %v942_v10, %v922_v6  ;;  %v999_v17 = vmul.f32 %v2388_v25, %v2398_v48  ;;  %v1050_v56 = vadd.f32 %v1034_v12, %v1014_v16  ;;  %v1127_v43 = vmul.f32 %v2628_v3, %v2777_v5  ;;  %v1341_v12 = vpop.permute.xlu1 %1340 }
 0x112   : > { %v1033_v22 = vmul.f32 %v2413_v44, %v2788_v53  ;;  %v1106_v29 = vadd.f32 %v1090_v46, %v1070_v45  ;;  %v1253_v36 = vmul.f32 %v2685_v19, %v956_v42  ;;  %v3364_v0 = vrot.slane %v2585_v26, 7  ;;  %v3387_v53 = vld [vmem:[#allocation39_spill] sm:$0xff] }
 0x113   : > { %v3365_v33 = vrot.slane %v2440_v60, 7  ;;  %v1052_v49 = vadd.f32 %v1036_v13, %v1016_v55  ;;  %v1256_v11 = vmul.f32 %v1223_v31, %v959_v62  ;;  %v1015_v48 = vadd.f32 %v999_v17, %v979_v4  ;;  %v3367_v13 = vld [vmem:[#allocation31_spill] sm:$0xff] }
 0x114   : > { %v1143_v16 = vadd.f32 %v1127_v43, %v1107_v20  ;;  %v1270_v32 = vadd.f32 %v1254_v40, %v1050_v56  ;;  %v1049_v61 = vadd.f32 %v1033_v22, %v1013_v58  ;;  %v1126_v27 = vmul.f32 %v2628_v3, %v866_v30  ;;  %v845_v40 = vpop.permute.xlu0 %844 }
 0x115   : > { %v603_v10 = vsel %vm599_vm1, %v3365_v33, %v3364_v0  ;;  %v3366_v35 = vrot.slane %v2585_v26, 1  ;;  %v1035_v19 = vmul.f32 %v2413_v44, %v2777_v5  ;;  %v1255_v6 = vmul.f32 %v1218_v54, %v958_v15 }
 0x116   : > { %v743_v45 = vrot.slane %v2588_v24, 1  ;;  %v724_v31 = vmul.f32 %v3367_v13, %v603_v10  ;;  %v1382_v4 = vmul.f32 %v1341_v12, %v1143_v16  ;;  %v1142_v55 = vadd.f32 %v1126_v27, %v1106_v29  ;;  %v3375_v13 = vld [vmem:[#allocation3_spill] sm:$0xff] }
 0x117   : > { %v747_v42 = vsel %vm744_vm2, %v3366_v35, %v741_v57  ;;  %v1269_v20 = vadd.f32 %v1253_v36, %v1049_v61  ;;  %v742_v62 = vrot.slane %v2555_v38, 1  ;;  %v2874_v30 = vadd.f32 %v1256_v11, %v1052_v49  ;;  %v850_v36 = vpop.permute.xlu1 %849  ;;  %v3374_v49 = vld [vmem:[#allocation2_spill] sm:$0xff] }
 0x118   : > { %v1051_v58 = vadd.f32 %v1035_v19, %v1015_v48  ;;  %v2877_v46 = vmul.f32 %v2653_v39, %v747_v42  ;;  %v3368_v17 = vrot.slane %v2588_v24, 7  ;;  %v3369_v5 = vrot.slane %v2555_v38, 7  ;;  %v2921_v42 = vld [vmem:[%s3239_s4] ss:$0 sm:$0xff] }
 0x119   : > { %v1398_v15 = vadd.f32 %v1382_v4, %v1270_v32  ;;  %v1381_v56 = vmul.f32 %v1336_v14, %v1142_v55  ;;  %v746_v43 = vsel %vm744_vm2, %v741_v57, %v742_v62  ;;  %v3370_v22 = vrot.slane %v2614_v1, 7 }
 0x11a   : > { %v600_v54 = vsel %vm599_vm1, %v3369_v5, %v3368_v17  ;;  %v3371_v29 = vmov %v3364_v0  ;;  %v3372_v0 = vrot.slane %v2368_v9, 1  ;;  %v2897_v10 = vmul.f32 %v845_v40, %v746_v43 }
 0x11b   : > { %v602_v39 = vsel %vm599_vm1, %v3371_v29, %v3370_v22  ;;  %v1073_v14 = vmul.f32 %v2421_v18, %v724_v31  ;;  %v2901_v11 = vmul.f32 %v3374_v49, %v600_v54  ;;  %v2903_v57 = vadd.f32 %v1255_v6, %v1051_v58  ;;  %v1351_v54 = vpop.permute.xlu1 %1350 }
 0x11c   : > { %v760_v33 = vsel %vm744_vm2, %v743_v45, %v3372_v0  ;;  %3373 = vst [vmem:[#allocation24_spill] sm:$0xff] %v2897_v10  ;;  %v1397_v48 = vadd.f32 %v1381_v56, %v1269_v20  ;;  %v1093_v12 = vmul.f32 %v2390_v28, %v2585_v26  ;;  %v1072_v16 = vmul.f32 %v2421_v18, %v2754_v2  ;;  %v1346_v0 = vpop.permute.xlu0 %1345 }
 0x11d   : > { %v745_v32 = vsel %vm744_vm2, %v742_v62, %v743_v45  ;;  %v1129_v61 = vmul.f32 %v2628_v3, %v2877_v46  ;;  %v2914_v27 = vmul.f32 %v2762_v7, %v602_v39  ;;  %v892_v35 = vmul.f32 %v2400_v59, %v2901_v11 }
 0x11e   : > { %v2923_v19 = vmul.f32 %v850_v36, %v745_v32  ;;  %v1092_v6 = vmul.f32 %v2390_v28, %v2440_v60  ;;  %v1128_v45 = vmul.f32 %v2628_v3, %v2801_v23  ;;  %v2930_v4 = vmul.f32 %v3375_v13, %v760_v33  ;;  %v3379_v13 = vld [vmem:[#allocation29_spill] sm:$0xff] }
 0x11f   : > { %v2933_v7 = vadd.f32 %v2921_v42, %v1398_v15  ;;  %v2937_v55 = vmul.f32 %v2413_v44, %v2897_v10  ;;  %v1109_v20 = vadd.f32 %v1093_v12, %v1073_v14  ;;  %v889_v62 = vmul.f32 %v2400_v59, %v724_v31  ;;  %v3388_v10 = vld [vmem:[#allocation6_spill] sm:$0xff] }
 0x120   : > { %v2941_v40 = vadd.f32 %v2921_v42, %v1397_v48  ;;  %v1108_v58 = vadd.f32 %v1092_v6, %v1072_v16  ;;  %v909_v17 = vmul.f32 %v2382_v21, %v2585_v26  ;;  %v928_v5 = vadd.f32 %v2692_v50, %v892_v35  ;;  %v3376_v16 = vld [vmem:[#allocation25_spill] sm:$0xff] }
 0x121   : > { %v1145_v56 = vadd.f32 %v1129_v61, %v1109_v20  ;;  %v945_v15 = vmul.f32 %v3347_v34, %v2877_v46  ;;  %v2950_v43 = vmul.f32 %v2411_v8, %v2914_v27  ;;  %v2954_v22 = vmul.f32 %v2388_v25, %v2614_v1  ;;  %v3377_v61 = vld [vmem:[#allocation34_spill] sm:$0xff] }
 0x122   : > { %v1144_v29 = vadd.f32 %v1128_v45, %v1108_v58  ;;  %v888_v39 = vmul.f32 %v2400_v59, %v2754_v2  ;;  %v948_v50 = vmul.f32 %v3347_v34, %v2930_v4  ;;  %v877_v36 = vmul.f32 %v2400_v59, %v2688_v37  ;;  %v3378_v45 = vld [vmem:[#allocation26_spill] sm:$0xff] }
 0x123   : > { %v925_v33 = vadd.f32 %v909_v17, %v889_v62  ;;  %v908_v14 = vmul.f32 %v2382_v21, %v2440_v60  ;;  %v2966_v49 = vmul.f32 %v3347_v34, %v2801_v23  ;;  %v969_v48 = vmul.f32 %v2411_v8, %v2688_v37  ;;  %v3380_v17 = vld [vmem:[#allocation30_spill] sm:$0xff] }
 0x124   : > { %v2970_v12 = vmul.f32 %v1351_v54, %v1145_v56  ;;  %v964_v2 = vadd.f32 %v948_v50, %v928_v5  ;;  %v913_v32 = vadd.f32 %v3376_v16, %v877_v36  ;;  %v933_v35 = vmul.f32 %v3347_v34, %v3377_v61  ;;  %v3381_v36 = vld [vmem:[#allocation22_spill] sm:$0xff]  ;;  %v3382_v16 = vld [vmem:[#allocation35_spill] sm:$0xff] }
 0x125   : > { %v2976_v6 = vmul.f32 %v2411_v8, %v724_v31  ;;  %v1005_v60 = vadd.f32 %v3378_v45, %v969_v48  ;;  %v1025_v23 = vmul.f32 %v2413_v44, %v3377_v61  ;;  %v1063_v20 = vmul.f32 %v2421_v18, %v3379_v13  ;;  %v3383_v61 = vld [vmem:[#allocation28_spill] sm:$0xff] }
 0x126   : > { %v2983_v62 = vmul.f32 %v1346_v0, %v1144_v29  ;;  %v949_v58 = vadd.f32 %v933_v35, %v913_v32  ;;  %v1026_v5 = vmul.f32 %v2413_v44, %v3380_v17  ;;  %v1118_v54 = vmul.f32 %v2628_v3, %v3380_v17  ;;  %v3384_v13 = vld [vmem:[#allocation36_spill] sm:$0xff]  ;;  %v3386_v35 = vld [vmem:[#allocation5_spill] sm:$0xff] }
 0x127   : > { %v961_v56 = vadd.f32 %v945_v15, %v925_v33  ;;  %v924_v31 = vadd.f32 %v908_v14, %v888_v39  ;;  %v1041_v50 = vadd.f32 %v1025_v23, %v1005_v60  ;;  %v1099_v48 = vadd.f32 %v3381_v36, %v1063_v20  ;;  %v3385_v0 = vld [vmem:[#allocation4_spill] sm:$0xff]  ;;  %v3389_v15 = vld [vmem:[#allocation9_spill] sm:$0xff]  ;;  %v3390_v33 = vld [vmem:[#allocation10_spill] sm:$0xff] }
 0x128   : > { %v1042_v45 = vadd.f32 %v1026_v5, %v3382_v16  ;;  %v1119_v9 = vmul.f32 %v2628_v3, %v3383_v61  ;;  %v1134_v29 = vadd.f32 %v1118_v54, %v3384_v13  ;;  %v1245_v32 = vmul.f32 %v3385_v0, %v964_v2  ;;  %v3391_v20 = vld [vmem:[#allocation7_spill] sm:$0xff] }
 0x129   : > { %v1246_v37 = vmul.f32 %v3386_v35, %v949_v58  ;;  %v1248_v28 = vmul.f32 %v3388_v10, %v3387_v53  ;;  %v1375_v39 = vmul.f32 %v3389_v15, %v2681_v47  ;;  %v1376_v14 = vmul.f32 %v3390_v33, %v2798_v51  ;;  %v3392_v61 = vld [vmem:[#allocation43_spill] sm:$0xff]  ;;  %v3393_v58 = vld [vmem:[#allocation44_spill] sm:$0xff]  ;;  %v3395_v51 = vld [vmem:[#allocation33_spill] sm:$0xff] }
 0x12a   : > { %v1135_v60 = vadd.f32 %v1119_v9, %v1099_v48  ;;  %v1261_v23 = vadd.f32 %v1245_v32, %v1041_v50  ;;  %v1373_v17 = vmul.f32 %v3391_v20, %v1134_v29  ;;  %v936_v5 = vmul.f32 %v3347_v34, %v3392_v61  ;;  %v3394_v47 = vld [vmem:[#allocation8_spill] sm:$0xff]  ;;  %v3397_v29 = vld [vmem:[#allocation51_spill] sm:$0xff]  ;;  %v3399_v15 = vld [vmem:[#allocation53_spill] sm:$0xff] }
 0x12b   : > { %v1262_v54 = vadd.f32 %v1246_v37, %v1042_v45  ;;  %v1264_v2 = vadd.f32 %v1248_v28, %v2678_v41  ;;  %v1391_v36 = vadd.f32 %v1375_v39, %v3393_v58  ;;  %v937_v53 = vmul.f32 %v3347_v34, %v2705_v52  ;;  %v3396_v37 = vld [vmem:[#allocation46_spill] sm:$0xff]  ;;  %v3398_v32 = vld [vmem:[#allocation47_spill] sm:$0xff] }
 0x12c   : > { %v1374_v10 = vmul.f32 %v3394_v47, %v1135_v60  ;;  %v1389_v16 = vadd.f32 %v1373_v17, %v1261_v23  ;;  %v952_v9 = vadd.f32 %v936_v5, %v3395_v51  ;;  %v1029_v50 = vmul.f32 %v2413_v44, %v2705_v52  ;;  %v3400_v52 = vld [vmem:[#allocation20_spill] sm:$0xff]  ;;  %v3401_v61 = vld [vmem:[#allocation42_spill] sm:$0xff]  ;;  %v3404_v47 = vld [vmem:[#allocation13_spill] sm:$0xff] }
 0x12d   : > { %v1392_v48 = vadd.f32 %v1376_v14, %v1264_v2  ;;  %v1414_v13 = vadd.f32 %v2921_v42, %v1391_v36  ;;  %v953_v45 = vadd.f32 %v937_v53, %v3396_v37  ;;  %v1030_v28 = vmul.f32 %v2413_v44, %v3397_v29  ;;  %v3403_v36 = vld [vmem:[#allocation54_spill] sm:$0xff] }
 0x12e   : > { %v1390_v41 = vadd.f32 %v1374_v10, %v1262_v54  ;;  %v1412_v0 = vadd.f32 %v2921_v42, %v1389_v16  ;;  %v1045_v35 = vadd.f32 %v1029_v50, %v3398_v32  ;;  %v1067_v39 = vmul.f32 %v2421_v18, %v3399_v15  ;;  %v3402_v54 = vld [vmem:[#allocation45_spill] sm:$0xff]  ;;  %v3405_v16 = vld [vmem:[#allocation14_spill] sm:$0xff]  ;;  %v1233_v50 = vpop.permute.xlu1 %1232 }
 0x12f   : > { %v1415_v33 = vadd.f32 %v2921_v42, %v1392_v48  ;;  %v1430_v60 = vmax.f32 %v1414_v13, 0.0  ;;  %v1046_v14 = vadd.f32 %v1030_v28, %v3400_v52  ;;  %v1122_v23 = vmul.f32 %v2628_v3, %v3397_v29 }
 0x130   : > { %v1413_v20 = vadd.f32 %v2921_v42, %v1390_v41  ;;  %v1428_v17 = vmax.f32 %v1412_v0, 0.0  ;;  %v1103_v5 = vadd.f32 %v3401_v61, %v1067_v39  ;;  %v1123_v2 = vmul.f32 %v2628_v3, %v3402_v54  ;;  %v1228_v0 = vpop.permute.xlu0 %1227  ;;  %v3409_v61 = vld [vmem:[#allocation23_spill] sm:$0xff] }
 0x131   : > { %v1431_v58 = vmax.f32 %v1415_v33, 0.0  ;;  %v1138_v53 = vadd.f32 %v1122_v23, %v3403_v36  ;;  %v1249_v10 = vmul.f32 %v3404_v47, %v952_v9  ;;  %v1250_v51 = vmul.f32 %v3405_v16, %v953_v45  ;;  %v3408_v9 = vld [vmem:[#allocation21_spill] sm:$0xff] }
 0x132   : > { %v1001_v48 = vmul.f32 %v2388_v25, %v2585_v26  ;;  %v3406_v13 = vrot.slane %v2555_v38, 7  ;;  %v3407_v37 = vrot.slane %v2614_v1, 7  ;;  %v1429_v28 = vmax.f32 %v1413_v20, 0.0 }
 0x133   : > { %v1139_v41 = vadd.f32 %v1123_v2, %v1103_v5  ;;  %v1445_v32 = vpack.c.bf16 %v1431_v58, %v1430_v60  ;;  %v1265_v39 = vadd.f32 %v1249_v10, %v1045_v35  ;;  %v1266_v33 = vadd.f32 %v1250_v51, %v1046_v14  ;;  %v3410_v2 = vld [vmem:[#allocation12_spill] sm:$0xff] }
 0x134   : > { %v601_v29 = vsel %vm599_vm1, %v3407_v37, %v3406_v13  ;;  %v1377_v52 = vmul.f32 %v3408_v9, %v1138_v53  ;;  %v960_v45 = vadd.f32 %v2966_v49, %v924_v31  ;;  %v1037_v26 = vmul.f32 %v2413_v44, %v2877_v46 }
 0x135   : > { %v1444_v23 = vpack.c.bf16 %v1429_v28, %v1428_v17  ;;  %v1378_v36 = vmul.f32 %v3409_v61, %v1139_v41  ;;  %v3047_v63 = vmul.f32 %v2413_v44, %v2923_v19  ;;  %v1018_v20 = vadd.f32 %v2954_v22, %v2950_v43 }
 0x136   : > { %v1258_v60 = vmul.f32 %v1233_v50, %v961_v56  ;;  %v1393_v35 = vadd.f32 %v1377_v52, %v1265_v39  ;;  %v1017_v14 = vadd.f32 %v1001_v48, %v2976_v6  ;;  %v1257_v5 = vmul.f32 %v1228_v0, %v960_v45  ;;  %v3411_v48 = vld [vmem:[#allocation38_spill] sm:$0xff]  ;;  %v1238_v39 = vpop.permute.xlu0 %1237  ;;  %v3413_v45 = vld [vmem:[#allocation40_spill] sm:$0xff] }
 0x137   : > { %v3053_v49 = vmul.f32 %v3410_v2, %v601_v29  ;;  %1901 = vmatprep.mubr.msk.bf16.mxu0 %vm1573_vm3, %v1444_v23  ;;  %v1394_v46 = vadd.f32 %v1378_v36, %v1266_v33  ;;  %v1437_v31 = vmax.f32 %v2933_v7, 0.0  ;;  %v1436_v17 = vmax.f32 %v2941_v40, 0.0 }
 0x138   : > { %v1054_v58 = vadd.f32 %v2937_v55, %v1018_v20  ;;  %1902 = vmatmul.mubr.msk.bf16.vlgmr.msra.gmra.mxu0 %vm1573_vm3, %v1445_v32  ;;  %v1416_v43 = vadd.f32 %v2921_v42, %v1393_v35  ;;  %v3063_v22 = vadd.f32 %v2970_v12, %v2874_v30  ;;  %v3067_v6 = vadd.f32 %v2983_v62, %v2903_v57  ;;  %v1243_v32 = vpop.permute.xlu1 %1242 }
 0x139   : > { %v1053_v56 = vadd.f32 %v1037_v26, %v1017_v14  ;;  %v1417_v53 = vadd.f32 %v2921_v42, %v1394_v46  ;;  %v911_v55 = vmul.f32 %v2382_v21, %v2555_v38  ;;  %v883_v16 = vmul.f32 %v2400_v59, %v3399_v15  ;;  %v3415_v14 = vld [vmem:[#allocation11_spill] sm:$0xff]  ;;  %v3416_v46 = vld [vmem:[#allocation24_spill] sm:$0xff] }
 0x13a   : > { %v3070_v47 = vadd.f32 %v1258_v60, %v1054_v58  ;;  %v1432_v10 = vmax.f32 %v1416_v43, 0.0  ;;  %v891_v30 = vmul.f32 %v2400_v59, %v3053_v49  ;;  %v947_v57 = vmul.f32 %v3347_v34, %v2923_v19  ;;  %v3417_v43 = vld [vmem:[#allocation27_spill] sm:$0xff] }
 0x13b   : > { %v3076_v51 = vadd.f32 %v1257_v5, %v1053_v56  ;;  %v1433_v12 = vmax.f32 %v1417_v53, 0.0  ;;  %v984_v62 = vmul.f32 %v2411_v8, %v2901_v11  ;;  %v1075_v50 = vmul.f32 %v2421_v18, %v3053_v49  ;;  %v3418_v53 = vld [vmem:[#allocation15_spill] sm:$0xff] }
 0x13c   : > { %v919_v13 = vadd.f32 %v3411_v48, %v883_v16  ;;  %v975_v37 = vmul.f32 %v2411_v8, %v3399_v15  ;;  %v1004_v29 = vmul.f32 %v2388_v25, %v2588_v24  ;;  %v3093_v28 = vmul.f32 %v2413_v44, %v2930_v4  ;;  %v3412_v15 = vld [vmem:[#allocation19_spill] sm:$0xff]  ;;  %v3422_v48 = vld [vmem:[#allocation48_spill] sm:$0xff] }
 0x13d   : > { %v1446_v41 = vpack.c.bf16 %v1433_v12, %v1432_v10  ;;  %v939_v0 = vmul.f32 %v3347_v34, %v3402_v54  ;;  %v890_v33 = vmul.f32 %v2400_v59, %v2914_v27  ;;  %v910_v9 = vmul.f32 %v2382_v21, %v2614_v1  ;;  %v3414_v21 = vld [vmem:[#allocation52_spill] sm:$0xff]  ;;  %v3420_v16 = vld [vmem:[#allocation55_spill] sm:$0xff] }
 0x13e   : > { %v1095_v52 = vmul.f32 %v3412_v15, %v2555_v38  ;;  %v1011_v26 = vadd.f32 %v3413_v45, %v975_v37  ;;  %v927_v23 = vadd.f32 %v911_v55, %v891_v30  ;;  %v1074_v61 = vmul.f32 %v2421_v18, %v2914_v27  ;;  %v3419_v55 = vld [vmem:[#allocation50_spill] sm:$0xff]  ;;  %v3421_v30 = vld [vmem:[#allocation17_spill] sm:$0xff] }
 0x13f   : > { %1905 = vmatprep.mubr.msk.bf16.mxu0 %vm1573_vm3, %v1446_v41  ;;  %v955_v36 = vadd.f32 %v939_v0, %v919_v13  ;;  %v1031_v20 = vmul.f32 %v2413_v44, %v3402_v54  ;;  %v1131_v59 = vmul.f32 %v2628_v3, %v2923_v19  ;;  %v1069_v35 = vmul.f32 %v2421_v18, %v3414_v21  ;;  %v3423_v13 = vld [vmem:[#allocation49_spill] sm:$0xff]  ;;  %v3424_v41 = vld [vmem:[#allocation18_spill] sm:$0xff] }
 0x140   : > { %v1111_v60 = vadd.f32 %v1095_v52, %v1075_v50  ;;  %v1124_v5 = vmul.f32 %v2628_v3, %v3415_v14  ;;  %v1094_v2 = vmul.f32 %v3412_v15, %v2614_v1  ;;  %v1130_v27 = vmul.f32 %v2628_v3, %v3416_v46  ;;  %v1356_v52 = vpop.permute.xlu0 %1355  ;;  %v3425_v21 = vld [vmem:[#allocation37_spill] sm:$0xff] }
 0x141   : > { %v1032_v58 = vmul.f32 %v2413_v44, %v3415_v14  ;;  %v1047_v54 = vadd.f32 %v1031_v20, %v1011_v26  ;;  %v1105_v56 = vadd.f32 %v3417_v43, %v1069_v35  ;;  %v1125_v19 = vmul.f32 %v2628_v3, %v3418_v53  ;;  %v1361_v44 = vpop.permute.xlu1 %1360  ;;  %v3426_v43 = vld [vmem:[#allocation16_spill] sm:$0xff]  ;;  %v3427_v53 = vld [vmem:[#allocation41_spill] sm:$0xff] }
 0x142   : > { %v1140_v10 = vadd.f32 %v1124_v5, %v3419_v55  ;;  %v1251_v12 = vmul.f32 %v3421_v30, %v3420_v16  ;;  %v1110_v50 = vadd.f32 %v1094_v2, %v1074_v61  ;;  %v1061_v1 = vmul.f32 %v2421_v18, %v3422_v48 }
 0x143   : > { %v1048_v37 = vadd.f32 %v1032_v58, %v3423_v13  ;;  %v1252_v0 = vmul.f32 %v3424_v41, %v955_v36  ;;  %v1076_v45 = vmul.f32 %v2421_v18, %v2901_v11  ;;  %v1141_v26 = vadd.f32 %v1125_v19, %v1105_v56 }
 0x144   : > { %v1267_v20 = vadd.f32 %v1251_v12, %v1047_v54  ;;  %v1379_v35 = vmul.f32 %v3425_v21, %v1140_v10  ;;  %v946_v14 = vmul.f32 %v3347_v34, %v3416_v46  ;;  %v1147_v61 = vadd.f32 %v1131_v59, %v1111_v60 }
 0x145   : > { %v1146_v5 = vadd.f32 %v1130_v27, %v1110_v50  ;;  %v1268_v2 = vadd.f32 %v1252_v0, %v1048_v37  ;;  %v1081_v58 = vmul.f32 %v3412_v15, %v3426_v43  ;;  %v1096_v36 = vmul.f32 %v3412_v15, %v2588_v24  ;;  %v3428_v15 = vld [vmem:[#allocation34_spill] sm:$0xff] }
 0x146   : > { %v1380_v55 = vmul.f32 %v3427_v53, %v1141_v26  ;;  %v1395_v16 = vadd.f32 %v1379_v35, %v1267_v20  ;;  %v926_v18 = vadd.f32 %v910_v9, %v890_v33  ;;  %v983_v11 = vmul.f32 %v2411_v8, %v3053_v49  ;;  %v1883_v35 = vpop.f32.mrf.mxu1  ;;  %v3175_v43 = vld [vmem:[%s3242_s7] ss:$0 sm:$0xff] }
 0x147   : > { %v1386_v54 = vmul.f32 %v1361_v44, %v1147_v61  ;;  %v1385_v56 = vmul.f32 %v1356_v52, %v1146_v5  ;;  %v1097_v19 = vadd.f32 %v1081_v58, %v1061_v1  ;;  %v1112_v34 = vadd.f32 %v1096_v36, %v1076_v45 }
 0x148   : > { %v1396_v60 = vadd.f32 %v1380_v55, %v1268_v2  ;;  %v1418_v59 = vadd.f32 %v2921_v42, %v1395_v16  ;;  %v963_v46 = vadd.f32 %v947_v57, %v927_v23  ;;  %v1020_v27 = vadd.f32 %v1004_v29, %v984_v62  ;;  %v1371_v62 = vpop.permute.xlu1 %1370  ;;  %v1366_v29 = vpop.permute.xlu0 %1365 }
 0x149   : > { %v962_v10 = vadd.f32 %v946_v14, %v926_v18  ;;  %v1003_v24 = vmul.f32 %v2388_v25, %v2555_v38  ;;  %v1117_v30 = vmul.f32 %v2628_v3, %v3428_v15  ;;  %v1132_v33 = vmul.f32 %v2628_v3, %v2930_v4  ;;  %v1498_v14 = vpop.f32.mrf.mxu1 }
 0x14a   : > { %v1419_v8 = vadd.f32 %v2921_v42, %v1396_v60  ;;  %v1434_v49 = vmax.f32 %v1418_v59, 0.0  ;;  %v1260_v9 = vmul.f32 %v1243_v32, %v963_v46  ;;  %v1402_v50 = vadd.f32 %v1386_v54, %v3070_v47 }
 0x14b   : > { %v1019_v12 = vadd.f32 %v1003_v24, %v983_v11  ;;  %v1401_v57 = vadd.f32 %v1385_v56, %v3076_v51  ;;  %v1259_v23 = vmul.f32 %v1238_v39, %v962_v10  ;;  %v1133_v48 = vadd.f32 %v1117_v30, %v1097_v19  ;;  %v1884_v61 = vpop.f32.mrf.mxu1 }
 0x14c   : > { %v1148_v25 = vadd.f32 %v1132_v33, %v1112_v34  ;;  %v1435_v38 = vmax.f32 %v1419_v8, 0.0  ;;  %v1423_v1 = vadd.f32 %v2921_v42, %v3063_v22  ;;  %v1422_v3 = vadd.f32 %v2921_v42, %v3067_v6 }
 0x14d   : > { %v1056_v4 = vadd.f32 %v3093_v28, %v1020_v27  ;;  %v1055_v32 = vadd.f32 %v3047_v63, %v1019_v12  ;;  %v1388_v13 = vmul.f32 %v1371_v62, %v1133_v48  ;;  %v1448_v51 = vpack.c.bf16 %v1437_v31, %v1436_v17  ;;  %v1501_v5 = vpop.f32.mrf.mxu1 }
 0x14e   : > { %v1387_v47 = vmul.f32 %v1366_v29, %v1148_v25  ;;  %v1447_v37 = vpack.c.bf16 %v1435_v38, %v1434_v49  ;;  %v1425_v39 = vadd.f32 %v2921_v42, %v1402_v50  ;;  %v1424_v41 = vadd.f32 %v2921_v42, %v1401_v57 }
 0x14f   : > { %v1276_v22 = vadd.f32 %v1260_v9, %v1056_v4  ;;  %v1275_v0 = vadd.f32 %v1259_v23, %v1055_v32  ;;  %v1439_v6 = vmax.f32 %v1423_v1, 0.0  ;;  %v1438_v63 = vmax.f32 %v1422_v3, 0.0  ;;  %v1887_v58 = vpop.f32.mrf.mxu1 }
 0x150   : > { %1906 = vmatmul.mubr.msk.bf16.gmra.mxu0 %vm1573_vm3, %v1447_v37  ;;  %v1441_v52 = vmax.f32 %v1425_v39, 0.0  ;;  %v1440_v45 = vmax.f32 %v1424_v41, 0.0 }
 0x151   : > { %1909 = vmatprep.mubr.msk.bf16.mxu0 %vm1573_vm3, %v1448_v51  ;;  %v1404_v28 = vadd.f32 %v1388_v13, %v1276_v22  ;;  %v1403_v44 = vadd.f32 %v1387_v47, %v1275_v0  ;;  %v1449_v40 = vpack.c.bf16 %v1439_v6, %v1438_v63  ;;  %v1514_v54 = vpop.f32.mrf.mxu1 }
 0x152   : > { %v1450_v17 = vpack.c.bf16 %v1441_v52, %v1440_v45 }
 0x153   : > { %v1427_v7 = vadd.f32 %v2921_v42, %v1404_v28  ;;  %v1426_v31 = vadd.f32 %v2921_v42, %v1403_v44  ;;  %v1888_v59 = vpop.f32.mrf.mxu1 }
 0x155   : > { %v1443_v26 = vmax.f32 %v1427_v7, 0.0  ;;  %v1442_v20 = vmax.f32 %v1426_v31, 0.0  ;;  %v1517_v46 = vpop.f32.mrf.mxu1 }
 0x157   : > { %v1451_v21 = vpack.c.bf16 %v1443_v26, %v1442_v20  ;;  %v1891_v27 = vpop.f32.mrf.mxu1 }
 0x158   : > { %1910 = vmatmul.mubr.msk.bf16.gmra.mxu0 %vm1573_vm3, %v1449_v40 }
 0x159   : > { %1913 = vmatprep.mubr.msk.bf16.mxu0 %vm1573_vm3, %v1450_v17  ;;  %v1530_v10 = vpop.f32.mrf.mxu1 }
 0x15b   : > { %v1892_v33 = vpop.f32.mrf.mxu1 }
 0x15d   : > { %v1533_v62 = vpop.f32.mrf.mxu1 }
 0x15f   : > { %v1895_v1 = vpop.f32.mrf.mxu1 }
 0x160   : > { %1914 = vmatmul.mubr.msk.bf16.gmra.mxu0 %vm1573_vm3, %v1451_v21 }
 0x161   : > { %v1546_v51 = vpop.f32.mrf.mxu1 }
 0x163   : > { %v1896_v28 = vpop.f32.mrf.mxu1 }
 0x165   : > { %v1549_v17 = vpop.f32.mrf.mxu1 }
 0x1f8   : > { %v1903_v2 = vpop.f32.mrf.mxu0 }
 0x1f9   : > { %v1641_v42 = vadd.f32 %v1903_v2, %v1883_v35 }
 0x1fa   : > { %v1632_v36 = vpop.f32.mrf.mxu0 }
 0x1fb   : > { %v1704_v53 = vadd.f32 %v3175_v43, %v1641_v42  ;;  %v1633_v55 = vadd.f32 %v1632_v36, %v1498_v14 }
 0x1fc   : > { %v1904_v16 = vpop.f32.mrf.mxu0 }
 0x1fd   : > { %1720 = vst.msk [vmem:[%s3182_s24 + $0x10] sm:$0xff] %vm1573_vm3, %v1704_v53  ;;  %v1702_v18 = vadd.f32 %v3175_v43, %v1633_v55  ;;  %v1644_v11 = vadd.f32 %v1904_v16, %v1884_v61 }
 0x1fe   : > { %v1635_v56 = vpop.f32.mrf.mxu0 }
 0x1ff   : > { %1718 = vst.msk [vmem:[%s3182_s24] sm:$0xff] %vm1573_vm3, %v1702_v18  ;;  %v1705_v19 = vadd.f32 %v3175_v43, %v1644_v11  ;;  %v1636_v34 = vadd.f32 %v1635_v56, %v1501_v5 }
 0x201   : > { %1721 = vst.msk [vmem:[%s3182_s24 + $0x18] sm:$0xff] %vm1573_vm3, %v1705_v19  ;;  %v1703_v60 = vadd.f32 %v3175_v43, %v1636_v34 }
 0x203   : > { %1719 = vst.msk [vmem:[%s3182_s24 + $0x8] sm:$0xff] %vm1573_vm3, %v1703_v60 }
 0x210   : > { %v1907_v24 = vpop.f32.mrf.mxu0 }
 0x211   : > { %v1657_v15 = vadd.f32 %v1907_v24, %v1887_v58 }
 0x212   : > { %v1648_v30 = vpop.f32.mrf.mxu0 }
 0x213   : > { %v1708_v8 = vadd.f32 %v3175_v43, %v1657_v15  ;;  %v1649_v49 = vadd.f32 %v1648_v30, %v1514_v54 }
 0x214   : > { %v1908_v9 = vpop.f32.mrf.mxu0 }
 0x215   : > { %1724 = vst.msk [vmem:[%s3182_s24 + $0x30] sm:$0xff] %vm1573_vm3, %v1708_v8  ;;  %v1706_v12 = vadd.f32 %v3175_v43, %v1649_v49  ;;  %v1660_v50 = vadd.f32 %v1908_v9, %v1888_v59 }
 0x216   : > { %v1651_v57 = vpop.f32.mrf.mxu0 }
 0x217   : > { %1722 = vst.msk [vmem:[%s3182_s24 + $0x20] sm:$0xff] %vm1573_vm3, %v1706_v12  ;;  %v1709_v29 = vadd.f32 %v3175_v43, %v1660_v50  ;;  %v1652_v23 = vadd.f32 %v1651_v57, %v1517_v46 }
 0x218   : > { %v1911_v48 = vpop.f32.mrf.mxu0 }
 0x219   : > { %1725 = vst.msk [vmem:[%s3182_s24 + $0x38] sm:$0xff] %vm1573_vm3, %v1709_v29  ;;  %v1707_v25 = vadd.f32 %v3175_v43, %v1652_v23  ;;  %v1673_v38 = vadd.f32 %v1911_v48, %v1891_v27 }
 0x21a   : > { %v1664_v3 = vpop.f32.mrf.mxu0 }
 0x21b   : > { %1723 = vst.msk [vmem:[%s3182_s24 + $0x28] sm:$0xff] %vm1573_vm3, %v1707_v25  ;;  %v1712_v4 = vadd.f32 %v3175_v43, %v1673_v38  ;;  %v1665_v32 = vadd.f32 %v1664_v3, %v1530_v10 }
 0x21c   : > { %v1912_v13 = vpop.f32.mrf.mxu0 }
 0x21d   : > { %1728 = vst.msk [vmem:[%s3182_s24 + $0x50] sm:$0xff] %vm1573_vm3, %v1712_v4  ;;  %v1710_v47 = vadd.f32 %v3175_v43, %v1665_v32  ;;  %v1676_v37 = vadd.f32 %v1912_v13, %v1892_v33 }
 0x21e   : > { %v1667_v39 = vpop.f32.mrf.mxu0 }
 0x21f   : > { %1726 = vst.msk [vmem:[%s3182_s24 + $0x40] sm:$0xff] %vm1573_vm3, %v1710_v47  ;;  %v1713_v41 = vadd.f32 %v3175_v43, %v1676_v37  ;;  %v1668_v22 = vadd.f32 %v1667_v39, %v1533_v62 }
 0x220   : > { %v1915_v0 = vpop.f32.mrf.mxu0 }
 0x221   : > { %1729 = vst.msk [vmem:[%s3182_s24 + $0x58] sm:$0xff] %vm1573_vm3, %v1713_v41  ;;  %v1711_v6 = vadd.f32 %v3175_v43, %v1668_v22  ;;  %v1689_v63 = vadd.f32 %v1915_v0, %v1895_v1 }
 0x222   : > { %v1680_v44 = vpop.f32.mrf.mxu0 }
 0x223   : > { %1727 = vst.msk [vmem:[%s3182_s24 + $0x48] sm:$0xff] %vm1573_vm3, %v1711_v6  ;;  %v1716_v52 = vadd.f32 %v3175_v43, %v1689_v63  ;;  %v1681_v45 = vadd.f32 %v1680_v44, %v1546_v51 }
 0x224   : > { %v1916_v40 = vpop.f32.mrf.mxu0 }
 0x225   : > { %1732 = vst.msk [vmem:[%s3182_s24 + $0x70] sm:$0xff] %vm1573_vm3, %v1716_v52  ;;  %v1714_v7 = vadd.f32 %v3175_v43, %v1681_v45  ;;  %v1692_v31 = vadd.f32 %v1916_v40, %v1896_v28 }
 0x226   : > { %v1683_v26 = vpop.f32.mrf.mxu0 }
 0x227   : > { %1730 = vst.msk [vmem:[%s3182_s24 + $0x60] sm:$0xff] %vm1573_vm3, %v1714_v7  ;;  %v1717_v20 = vadd.f32 %v3175_v43, %v1692_v31  ;;  %v1684_v21 = vadd.f32 %v1683_v26, %v1549_v17 }
 0x229   : > { %1733 = vst.msk [vmem:[%s3182_s24 + $0x78] sm:$0xff] %vm1573_vm3, %v1717_v20  ;;  %v1715_v35 = vadd.f32 %v3175_v43, %v1684_v21 }
 0x22b   : > { %1731 = vst.msk [vmem:[%s3182_s24 + $0x68] sm:$0xff] %vm1573_vm3, %v1715_v35 }
 0x22c PF: > { %s22_s21 = sadd.s32 1, %s1940_s21  }
 0x22d   : > { %p19_p4 = scmp.ge.s32.totalorder %s22_s21, 4  }
 0x22f   :  { %21 = sbr.rel (!%p19_p4) target bundleno = 1 (0x1), region = 98 }

</bundles_post_ra>
